<compile_context>
chip_gen: v6e
topology: v6e:2x2x1
jax: 0.10.0
libtpu: 0.0.40
codegen_flags: <defaults>
</compile_context>

<pallas_src>
import jax
import jax.numpy as jnp
from jax.experimental import pallas as pl
from jax.experimental.pallas import tpu as pltpu


def make_fused_lstm_kernel(T, B, D, H, num_layers):
    """Builds the fused kernel (T, B, D, H, num_layers are static)."""

    def kernel(*refs):
        # refs = (x, [w_ih_t, w_hh_t, bias] * L, fc_w, fc_b, out, y_scr)
        x_ref = refs[0]
        layer_refs = [refs[1 + 3 * l: 4 + 3 * l] for l in range(num_layers)]
        fc_w_ref = refs[1 + 3 * num_layers]
        fc_b_ref = refs[2 + 3 * num_layers]
        out_ref = refs[3 + 3 * num_layers]
        y_scr = refs[4 + 3 * num_layers]          # (T*B, H) inter-layer buffer

        h_last = None
        for l, (wih_ref, whh_ref, b_ref) in enumerate(layer_refs):
            # Layer input, time-major flattened: (T*B, Din).
            layer_in = x_ref[...] if l == 0 else y_scr[...]

            # Hoisted input projection: one MXU matmul for all timesteps.
            pre = (
                jnp.dot(layer_in, wih_ref[...],
                        preferred_element_type=jnp.float32)
                + b_ref[...]
            )                                      # (T*B, 4H)

            whh = whh_ref[...]                     # (H, 4H), loaded once
            write_y = l < num_layers - 1           # last layer: only h_T needed

            h = jnp.zeros((B, H), jnp.float32)
            c = jnp.zeros((B, H), jnp.float32)

            for t in range(T):                     # static, fully unrolled
                gates = pre[t * B:(t + 1) * B, :] + jnp.dot(
                    h, whh, preferred_element_type=jnp.float32)   # (B, 4H)

                # Full-vreg transcendentals (EUP); slice results afterwards.
                sig = jax.nn.sigmoid(gates)
                tnh = jnp.tanh(gates)
                i_g = sig[:, 0 * H:1 * H]
                f_g = sig[:, 1 * H:2 * H]
                g_g = tnh[:, 2 * H:3 * H]
                o_g = sig[:, 3 * H:4 * H]

                c = f_g * c + i_g * g_g
                h = o_g * jnp.tanh(c)
                if write_y:
                    y_scr[t * B:(t + 1) * B, :] = h
            h_last = h

        # FC head on the last layer's last-step hidden state.
        out_ref[...] = (
            jnp.dot(h_last, fc_w_ref[...], preferred_element_type=jnp.float32)
            + fc_b_ref[...]
        ).astype(out_ref.dtype)

    return kernel


@jax.jit
def lstm_model_forward(x, params):
    """Equivalent of LSTM.forward: x (B, T, D) -> (B, 1)."""
    B, T, D = x.shape
    H = params["layers"][0][1].shape[0]
    num_layers = len(params["layers"])

    # Time-major, flattened to (T*B, D) so the kernel never reshapes.
    x_flat = jnp.transpose(x, (1, 0, 2)).reshape(T * B, D).astype(jnp.float32)

    flat_weights = []
    for (w_ih_t, w_hh_t, bias) in params["layers"]:
        flat_weights += [w_ih_t, w_hh_t, bias]

    kernel = make_fused_lstm_kernel(T, B, D, H, num_layers)
    n_inputs = 1 + len(flat_weights) + 2
    vmem = pl.BlockSpec(memory_space=pltpu.MemorySpace.VMEM)

    return pl.pallas_call(
        kernel,
        out_shape=jax.ShapeDtypeStruct((B, 1), jnp.float32),
        in_specs=[vmem] * n_inputs,
        out_specs=vmem,
        scratch_shapes=[
            pltpu.VMEM((T * B, H), jnp.float32),   # inter-layer hidden outputs
        ],
    )(x_flat, *flat_weights, params["fc_w_t"], params["fc_b"])


def init_params(key, input_size, hidden_size, num_layers):
    """Deterministic synthetic parameters, PyTorch-style init, pre-transposed."""
    layers = []
    bound = 1.0 / jnp.sqrt(hidden_size)
    for layer in range(num_layers):
        din = input_size if layer == 0 else hidden_size
        key, k1, k2, k3, k4 = jax.random.split(key, 5)
        w_ih = jax.random.uniform(k1, (4 * hidden_size, din), jnp.float32, -bound, bound)
        w_hh = jax.random.uniform(k2, (4 * hidden_size, hidden_size), jnp.float32, -bound, bound)
        b_ih = jax.random.uniform(k3, (4 * hidden_size,), jnp.float32, -bound, bound)
        b_hh = jax.random.uniform(k4, (4 * hidden_size,), jnp.float32, -bound, bound)
        layers.append((w_ih.T, w_hh.T, (b_ih + b_hh)[None, :]))
    key, k5, k6 = jax.random.split(key, 3)
    fc_w = jax.random.uniform(k5, (1, hidden_size), jnp.float32, -bound, bound)
    fc_b = jax.random.uniform(k6, (1,), jnp.float32, -bound, bound)
    return {"layers": layers, "fc_w_t": fc_w.T, "fc_b": fc_b[None, :]}


def reference_forward(x, params):
    """Pure-JAX reference for a correctness check."""
    x = jnp.transpose(x, (1, 0, 2)).astype(jnp.float32)  # (T, B, D)
    layer_in = x
    for (w_ih_t, w_hh_t, bias) in params["layers"]:
        T, B, _ = layer_in.shape
        H = w_hh_t.shape[0]
        h = jnp.zeros((B, H), jnp.float32)
        c = jnp.zeros((B, H), jnp.float32)
        ys = []
        for t in range(T):
            g = layer_in[t] @ w_ih_t + h @ w_hh_t + bias
            i = jax.nn.sigmoid(g[:, 0 * H:1 * H])
            f = jax.nn.sigmoid(g[:, 1 * H:2 * H])
            gg = jnp.tanh(g[:, 2 * H:3 * H])
            o = jax.nn.sigmoid(g[:, 3 * H:4 * H])
            c = f * c + i * gg
            h = o * jnp.tanh(c)
            ys.append(h)
        layer_in = jnp.stack(ys, axis=0)
    return layer_in[-1] @ params["fc_w_t"] + params["fc_b"]


if __name__ == "__main__":
    batch, seq, input_size, hidden, num_layers = 8, 8, 4, 32, 2

    key = jax.random.PRNGKey(0)
    key, xk = jax.random.split(key)
    x = jax.random.normal(xk, (batch, seq, input_size), jnp.float32)

    params = init_params(key, input_size, hidden, num_layers)

    out = lstm_model_forward(x, params)
    out = jax.block_until_ready(out)

    ref = reference_forward(x, params)
    assert out.shape == (batch, 1), out.shape
    assert jnp.allclose(out, ref, rtol=1e-4, atol=1e-4), (out, ref)

    print("KERNEL_OK")
</pallas_src>

<mosaic_0001>
module attributes {stable_mosaic.version = 11 : i64} {
  func.func @kernel(%arg0: memref<64x4xf32, #tpu.memory_space<vmem>>, %arg1: memref<4x128xf32, #tpu.memory_space<vmem>>, %arg2: memref<32x128xf32, #tpu.memory_space<vmem>>, %arg3: memref<1x128xf32, #tpu.memory_space<vmem>>, %arg4: memref<32x128xf32, #tpu.memory_space<vmem>>, %arg5: memref<32x128xf32, #tpu.memory_space<vmem>>, %arg6: memref<1x128xf32, #tpu.memory_space<vmem>>, %arg7: memref<32x1xf32, #tpu.memory_space<vmem>>, %arg8: memref<1x1xf32, #tpu.memory_space<vmem>>, %arg9: memref<8x1xf32, #tpu.memory_space<vmem>>, %arg10: memref<64x32xf32, #tpu.memory_space<vmem>>) attributes {dimension_semantics = [], scalar_prefetch = 0 : i64, scratch_operands = 1 : i64, tpu.core_type = #tpu.core_type<tc>} {
    %c0 = arith.constant 0 : index
    %c0_0 = arith.constant 0 : index
    %0 = vector.load %arg0[%c0, %c0_0] : memref<64x4xf32, #tpu.memory_space<vmem>>, vector<64x4xf32>
    %c0_1 = arith.constant 0 : index
    %c0_2 = arith.constant 0 : index
    %1 = vector.load %arg1[%c0_1, %c0_2] : memref<4x128xf32, #tpu.memory_space<vmem>>, vector<4x128xf32>
    %cst = arith.constant dense<0.000000e+00> : vector<64x128xf32>
    %2 = tpu.matmul %0, %1, %cst {dimension_numbers = #tpu.dot_dimension_numbers<[1], [0], [0], [1], [0, 0, 1, 1], [], []>} : vector<64x4xf32>, vector<4x128xf32>, vector<64x128xf32> -> vector<64x128xf32>
    %c0_3 = arith.constant 0 : index
    %c0_4 = arith.constant 0 : index
    %3 = vector.load %arg3[%c0_3, %c0_4] : memref<1x128xf32, #tpu.memory_space<vmem>>, vector<1x128xf32>
    %4 = vector.broadcast %3 : vector<1x128xf32> to vector<64x128xf32>
    %5 = arith.addf %2, %4 : vector<64x128xf32>
    %c0_5 = arith.constant 0 : index
    %c0_6 = arith.constant 0 : index
    %6 = vector.load %arg2[%c0_5, %c0_6] : memref<32x128xf32, #tpu.memory_space<vmem>>, vector<32x128xf32>
    %cst_7 = arith.constant 0.000000e+00 : f32
    %7 = vector.broadcast %cst_7 : f32 to vector<8x32xf32>
    %cst_8 = arith.constant 0.000000e+00 : f32
    %8 = vector.broadcast %cst_8 : f32 to vector<8x32xf32>
    %9 = vector.extract_strided_slice %5 {offsets = [0, 0], sizes = [8, 128], strides = [1, 1]} : vector<64x128xf32> to vector<8x128xf32>
    %cst_9 = arith.constant dense<0.000000e+00> : vector<8x128xf32>
    %10 = tpu.matmul %7, %6, %cst_9 {dimension_numbers = #tpu.dot_dimension_numbers<[1], [0], [0], [1], [0, 0, 1, 1], [], []>} : vector<8x32xf32>, vector<32x128xf32>, vector<8x128xf32> -> vector<8x128xf32>
    %11 = arith.addf %9, %10 : vector<8x128xf32>
    %12 = arith.negf %11 : vector<8x128xf32>
    %13 = math.exp %12 : vector<8x128xf32>
    %cst_10 = arith.constant 1.000000e+00 : f32
    %14 = vector.broadcast %cst_10 : f32 to vector<8x128xf32>
    %15 = arith.addf %14, %13 : vector<8x128xf32>
    %16 = arith.divf %14, %15 : vector<8x128xf32>
    %17 = math.tanh %11 : vector<8x128xf32>
    %18 = vector.extract_strided_slice %16 {offsets = [0, 0], sizes = [8, 32], strides = [1, 1]} : vector<8x128xf32> to vector<8x32xf32>
    %19 = vector.extract_strided_slice %16 {offsets = [0, 32], sizes = [8, 32], strides = [1, 1]} : vector<8x128xf32> to vector<8x32xf32>
    %20 = vector.extract_strided_slice %17 {offsets = [0, 64], sizes = [8, 32], strides = [1, 1]} : vector<8x128xf32> to vector<8x32xf32>
    %21 = vector.extract_strided_slice %16 {offsets = [0, 96], sizes = [8, 32], strides = [1, 1]} : vector<8x128xf32> to vector<8x32xf32>
    %22 = arith.mulf %19, %8 : vector<8x32xf32>
    %23 = arith.mulf %18, %20 : vector<8x32xf32>
    %24 = arith.addf %22, %23 : vector<8x32xf32>
    %25 = math.tanh %24 : vector<8x32xf32>
    %26 = arith.mulf %21, %25 : vector<8x32xf32>
    %c0_11 = arith.constant 0 : index
    %c0_12 = arith.constant 0 : index
    %27 = vector.load %arg10[%c0_11, %c0_12] : memref<64x32xf32, #tpu.memory_space<vmem>>, vector<8x32xf32>
    tpu.vector_store %arg10[%c0_11, %c0_12], %26 {strides = array<i32>} : memref<64x32xf32, #tpu.memory_space<vmem>>, vector<8x32xf32>,
    %28 = vector.extract_strided_slice %5 {offsets = [8, 0], sizes = [8, 128], strides = [1, 1]} : vector<64x128xf32> to vector<8x128xf32>
    %cst_13 = arith.constant dense<0.000000e+00> : vector<8x128xf32>
    %29 = tpu.matmul %26, %6, %cst_13 {dimension_numbers = #tpu.dot_dimension_numbers<[1], [0], [0], [1], [0, 0, 1, 1], [], []>} : vector<8x32xf32>, vector<32x128xf32>, vector<8x128xf32> -> vector<8x128xf32>
    %30 = arith.addf %28, %29 : vector<8x128xf32>
    %31 = arith.negf %30 : vector<8x128xf32>
    %32 = math.exp %31 : vector<8x128xf32>
    %cst_14 = arith.constant 1.000000e+00 : f32
    %33 = vector.broadcast %cst_14 : f32 to vector<8x128xf32>
    %34 = arith.addf %33, %32 : vector<8x128xf32>
    %35 = arith.divf %33, %34 : vector<8x128xf32>
    %36 = math.tanh %30 : vector<8x128xf32>
    %37 = vector.extract_strided_slice %35 {offsets = [0, 0], sizes = [8, 32], strides = [1, 1]} : vector<8x128xf32> to vector<8x32xf32>
    %38 = vector.extract_strided_slice %35 {offsets = [0, 32], sizes = [8, 32], strides = [1, 1]} : vector<8x128xf32> to vector<8x32xf32>
    %39 = vector.extract_strided_slice %36 {offsets = [0, 64], sizes = [8, 32], strides = [1, 1]} : vector<8x128xf32> to vector<8x32xf32>
    %40 = vector.extract_strided_slice %35 {offsets = [0, 96], sizes = [8, 32], strides = [1, 1]} : vector<8x128xf32> to vector<8x32xf32>
    %41 = arith.mulf %38, %24 : vector<8x32xf32>
    %42 = arith.mulf %37, %39 : vector<8x32xf32>
    %43 = arith.addf %41, %42 : vector<8x32xf32>
    %44 = math.tanh %43 : vector<8x32xf32>
    %45 = arith.mulf %40, %44 : vector<8x32xf32>
    %c8 = arith.constant 8 : index
    %c0_15 = arith.constant 0 : index
    %46 = vector.load %arg10[%c8, %c0_15] : memref<64x32xf32, #tpu.memory_space<vmem>>, vector<8x32xf32>
    tpu.vector_store %arg10[%c8, %c0_15], %45 {strides = array<i32>} : memref<64x32xf32, #tpu.memory_space<vmem>>, vector<8x32xf32>,
    %47 = vector.extract_strided_slice %5 {offsets = [16, 0], sizes = [8, 128], strides = [1, 1]} : vector<64x128xf32> to vector<8x128xf32>
    %cst_16 = arith.constant dense<0.000000e+00> : vector<8x128xf32>
    %48 = tpu.matmul %45, %6, %cst_16 {dimension_numbers = #tpu.dot_dimension_numbers<[1], [0], [0], [1], [0, 0, 1, 1], [], []>} : vector<8x32xf32>, vector<32x128xf32>, vector<8x128xf32> -> vector<8x128xf32>
    %49 = arith.addf %47, %48 : vector<8x128xf32>
    %50 = arith.negf %49 : vector<8x128xf32>
    %51 = math.exp %50 : vector<8x128xf32>
    %cst_17 = arith.constant 1.000000e+00 : f32
    %52 = vector.broadcast %cst_17 : f32 to vector<8x128xf32>
    %53 = arith.addf %52, %51 : vector<8x128xf32>
    %54 = arith.divf %52, %53 : vector<8x128xf32>
    %55 = math.tanh %49 : vector<8x128xf32>
    %56 = vector.extract_strided_slice %54 {offsets = [0, 0], sizes = [8, 32], strides = [1, 1]} : vector<8x128xf32> to vector<8x32xf32>
    %57 = vector.extract_strided_slice %54 {offsets = [0, 32], sizes = [8, 32], strides = [1, 1]} : vector<8x128xf32> to vector<8x32xf32>
    %58 = vector.extract_strided_slice %55 {offsets = [0, 64], sizes = [8, 32], strides = [1, 1]} : vector<8x128xf32> to vector<8x32xf32>
    %59 = vector.extract_strided_slice %54 {offsets = [0, 96], sizes = [8, 32], strides = [1, 1]} : vector<8x128xf32> to vector<8x32xf32>
    %60 = arith.mulf %57, %43 : vector<8x32xf32>
    %61 = arith.mulf %56, %58 : vector<8x32xf32>
    %62 = arith.addf %60, %61 : vector<8x32xf32>
    %63 = math.tanh %62 : vector<8x32xf32>
    %64 = arith.mulf %59, %63 : vector<8x32xf32>
    %c16 = arith.constant 16 : index
    %c0_18 = arith.constant 0 : index
    %65 = vector.load %arg10[%c16, %c0_18] : memref<64x32xf32, #tpu.memory_space<vmem>>, vector<8x32xf32>
    tpu.vector_store %arg10[%c16, %c0_18], %64 {strides = array<i32>} : memref<64x32xf32, #tpu.memory_space<vmem>>, vector<8x32xf32>,
    %66 = vector.extract_strided_slice %5 {offsets = [24, 0], sizes = [8, 128], strides = [1, 1]} : vector<64x128xf32> to vector<8x128xf32>
    %cst_19 = arith.constant dense<0.000000e+00> : vector<8x128xf32>
    %67 = tpu.matmul %64, %6, %cst_19 {dimension_numbers = #tpu.dot_dimension_numbers<[1], [0], [0], [1], [0, 0, 1, 1], [], []>} : vector<8x32xf32>, vector<32x128xf32>, vector<8x128xf32> -> vector<8x128xf32>
    %68 = arith.addf %66, %67 : vector<8x128xf32>
    %69 = arith.negf %68 : vector<8x128xf32>
    %70 = math.exp %69 : vector<8x128xf32>
    %cst_20 = arith.constant 1.000000e+00 : f32
    %71 = vector.broadcast %cst_20 : f32 to vector<8x128xf32>
    %72 = arith.addf %71, %70 : vector<8x128xf32>
    %73 = arith.divf %71, %72 : vector<8x128xf32>
    %74 = math.tanh %68 : vector<8x128xf32>
    %75 = vector.extract_strided_slice %73 {offsets = [0, 0], sizes = [8, 32], strides = [1, 1]} : vector<8x128xf32> to vector<8x32xf32>
    %76 = vector.extract_strided_slice %73 {offsets = [0, 32], sizes = [8, 32], strides = [1, 1]} : vector<8x128xf32> to vector<8x32xf32>
    %77 = vector.extract_strided_slice %74 {offsets = [0, 64], sizes = [8, 32], strides = [1, 1]} : vector<8x128xf32> to vector<8x32xf32>
    %78 = vector.extract_strided_slice %73 {offsets = [0, 96], sizes = [8, 32], strides = [1, 1]} : vector<8x128xf32> to vector<8x32xf32>
    %79 = arith.mulf %76, %62 : vector<8x32xf32>
    %80 = arith.mulf %75, %77 : vector<8x32xf32>
    %81 = arith.addf %79, %80 : vector<8x32xf32>
    %82 = math.tanh %81 : vector<8x32xf32>
    %83 = arith.mulf %78, %82 : vector<8x32xf32>
    %c24 = arith.constant 24 : index
    %c0_21 = arith.constant 0 : index
    %84 = vector.load %arg10[%c24, %c0_21] : memref<64x32xf32, #tpu.memory_space<vmem>>, vector<8x32xf32>
    tpu.vector_store %arg10[%c24, %c0_21], %83 {strides = array<i32>} : memref<64x32xf32, #tpu.memory_space<vmem>>, vector<8x32xf32>,
    %85 = vector.extract_strided_slice %5 {offsets = [32, 0], sizes = [8, 128], strides = [1, 1]} : vector<64x128xf32> to vector<8x128xf32>
    %cst_22 = arith.constant dense<0.000000e+00> : vector<8x128xf32>
    %86 = tpu.matmul %83, %6, %cst_22 {dimension_numbers = #tpu.dot_dimension_numbers<[1], [0], [0], [1], [0, 0, 1, 1], [], []>} : vector<8x32xf32>, vector<32x128xf32>, vector<8x128xf32> -> vector<8x128xf32>
    %87 = arith.addf %85, %86 : vector<8x128xf32>
    %88 = arith.negf %87 : vector<8x128xf32>
    %89 = math.exp %88 : vector<8x128xf32>
    %cst_23 = arith.constant 1.000000e+00 : f32
    %90 = vector.broadcast %cst_23 : f32 to vector<8x128xf32>
    %91 = arith.addf %90, %89 : vector<8x128xf32>
    %92 = arith.divf %90, %91 : vector<8x128xf32>
    %93 = math.tanh %87 : vector<8x128xf32>
    %94 = vector.extract_strided_slice %92 {offsets = [0, 0], sizes = [8, 32], strides = [1, 1]} : vector<8x128xf32> to vector<8x32xf32>
    %95 = vector.extract_strided_slice %92 {offsets = [0, 32], sizes = [8, 32], strides = [1, 1]} : vector<8x128xf32> to vector<8x32xf32>
    %96 = vector.extract_strided_slice %93 {offsets = [0, 64], sizes = [8, 32], strides = [1, 1]} : vector<8x128xf32> to vector<8x32xf32>
    %97 = vector.extract_strided_slice %92 {offsets = [0, 96], sizes = [8, 32], strides = [1, 1]} : vector<8x128xf32> to vector<8x32xf32>
    %98 = arith.mulf %95, %81 : vector<8x32xf32>
    %99 = arith.mulf %94, %96 : vector<8x32xf32>
    %100 = arith.addf %98, %99 : vector<8x32xf32>
    %101 = math.tanh %100 : vector<8x32xf32>
    %102 = arith.mulf %97, %101 : vector<8x32xf32>
    %c32 = arith.constant 32 : index
    %c0_24 = arith.constant 0 : index
    %103 = vector.load %arg10[%c32, %c0_24] : memref<64x32xf32, #tpu.memory_space<vmem>>, vector<8x32xf32>
    tpu.vector_store %arg10[%c32, %c0_24], %102 {strides = array<i32>} : memref<64x32xf32, #tpu.memory_space<vmem>>, vector<8x32xf32>,
    %104 = vector.extract_strided_slice %5 {offsets = [40, 0], sizes = [8, 128], strides = [1, 1]} : vector<64x128xf32> to vector<8x128xf32>
    %cst_25 = arith.constant dense<0.000000e+00> : vector<8x128xf32>
    %105 = tpu.matmul %102, %6, %cst_25 {dimension_numbers = #tpu.dot_dimension_numbers<[1], [0], [0], [1], [0, 0, 1, 1], [], []>} : vector<8x32xf32>, vector<32x128xf32>, vector<8x128xf32> -> vector<8x128xf32>
    %106 = arith.addf %104, %105 : vector<8x128xf32>
    %107 = arith.negf %106 : vector<8x128xf32>
    %108 = math.exp %107 : vector<8x128xf32>
    %cst_26 = arith.constant 1.000000e+00 : f32
    %109 = vector.broadcast %cst_26 : f32 to vector<8x128xf32>
    %110 = arith.addf %109, %108 : vector<8x128xf32>
    %111 = arith.divf %109, %110 : vector<8x128xf32>
    %112 = math.tanh %106 : vector<8x128xf32>
    %113 = vector.extract_strided_slice %111 {offsets = [0, 0], sizes = [8, 32], strides = [1, 1]} : vector<8x128xf32> to vector<8x32xf32>
    %114 = vector.extract_strided_slice %111 {offsets = [0, 32], sizes = [8, 32], strides = [1, 1]} : vector<8x128xf32> to vector<8x32xf32>
    %115 = vector.extract_strided_slice %112 {offsets = [0, 64], sizes = [8, 32], strides = [1, 1]} : vector<8x128xf32> to vector<8x32xf32>
    %116 = vector.extract_strided_slice %111 {offsets = [0, 96], sizes = [8, 32], strides = [1, 1]} : vector<8x128xf32> to vector<8x32xf32>
    %117 = arith.mulf %114, %100 : vector<8x32xf32>
    %118 = arith.mulf %113, %115 : vector<8x32xf32>
    %119 = arith.addf %117, %118 : vector<8x32xf32>
    %120 = math.tanh %119 : vector<8x32xf32>
    %121 = arith.mulf %116, %120 : vector<8x32xf32>
    %c40 = arith.constant 40 : index
    %c0_27 = arith.constant 0 : index
    %122 = vector.load %arg10[%c40, %c0_27] : memref<64x32xf32, #tpu.memory_space<vmem>>, vector<8x32xf32>
    tpu.vector_store %arg10[%c40, %c0_27], %121 {strides = array<i32>} : memref<64x32xf32, #tpu.memory_space<vmem>>, vector<8x32xf32>,
    %123 = vector.extract_strided_slice %5 {offsets = [48, 0], sizes = [8, 128], strides = [1, 1]} : vector<64x128xf32> to vector<8x128xf32>
    %cst_28 = arith.constant dense<0.000000e+00> : vector<8x128xf32>
    %124 = tpu.matmul %121, %6, %cst_28 {dimension_numbers = #tpu.dot_dimension_numbers<[1], [0], [0], [1], [0, 0, 1, 1], [], []>} : vector<8x32xf32>, vector<32x128xf32>, vector<8x128xf32> -> vector<8x128xf32>
    %125 = arith.addf %123, %124 : vector<8x128xf32>
    %126 = arith.negf %125 : vector<8x128xf32>
    %127 = math.exp %126 : vector<8x128xf32>
    %cst_29 = arith.constant 1.000000e+00 : f32
    %128 = vector.broadcast %cst_29 : f32 to vector<8x128xf32>
    %129 = arith.addf %128, %127 : vector<8x128xf32>
    %130 = arith.divf %128, %129 : vector<8x128xf32>
    %131 = math.tanh %125 : vector<8x128xf32>
    %132 = vector.extract_strided_slice %130 {offsets = [0, 0], sizes = [8, 32], strides = [1, 1]} : vector<8x128xf32> to vector<8x32xf32>
    %133 = vector.extract_strided_slice %130 {offsets = [0, 32], sizes = [8, 32], strides = [1, 1]} : vector<8x128xf32> to vector<8x32xf32>
    %134 = vector.extract_strided_slice %131 {offsets = [0, 64], sizes = [8, 32], strides = [1, 1]} : vector<8x128xf32> to vector<8x32xf32>
    %135 = vector.extract_strided_slice %130 {offsets = [0, 96], sizes = [8, 32], strides = [1, 1]} : vector<8x128xf32> to vector<8x32xf32>
    %136 = arith.mulf %133, %119 : vector<8x32xf32>
    %137 = arith.mulf %132, %134 : vector<8x32xf32>
    %138 = arith.addf %136, %137 : vector<8x32xf32>
    %139 = math.tanh %138 : vector<8x32xf32>
    %140 = arith.mulf %135, %139 : vector<8x32xf32>
    %c48 = arith.constant 48 : index
    %c0_30 = arith.constant 0 : index
    %141 = vector.load %arg10[%c48, %c0_30] : memref<64x32xf32, #tpu.memory_space<vmem>>, vector<8x32xf32>
    tpu.vector_store %arg10[%c48, %c0_30], %140 {strides = array<i32>} : memref<64x32xf32, #tpu.memory_space<vmem>>, vector<8x32xf32>,
    %142 = vector.extract_strided_slice %5 {offsets = [56, 0], sizes = [8, 128], strides = [1, 1]} : vector<64x128xf32> to vector<8x128xf32>
    %cst_31 = arith.constant dense<0.000000e+00> : vector<8x128xf32>
    %143 = tpu.matmul %140, %6, %cst_31 {dimension_numbers = #tpu.dot_dimension_numbers<[1], [0], [0], [1], [0, 0, 1, 1], [], []>} : vector<8x32xf32>, vector<32x128xf32>, vector<8x128xf32> -> vector<8x128xf32>
    %144 = arith.addf %142, %143 : vector<8x128xf32>
    %145 = arith.negf %144 : vector<8x128xf32>
    %146 = math.exp %145 : vector<8x128xf32>
    %cst_32 = arith.constant 1.000000e+00 : f32
    %147 = vector.broadcast %cst_32 : f32 to vector<8x128xf32>
    %148 = arith.addf %147, %146 : vector<8x128xf32>
    %149 = arith.divf %147, %148 : vector<8x128xf32>
    %150 = math.tanh %144 : vector<8x128xf32>
    %151 = vector.extract_strided_slice %149 {offsets = [0, 0], sizes = [8, 32], strides = [1, 1]} : vector<8x128xf32> to vector<8x32xf32>
    %152 = vector.extract_strided_slice %149 {offsets = [0, 32], sizes = [8, 32], strides = [1, 1]} : vector<8x128xf32> to vector<8x32xf32>
    %153 = vector.extract_strided_slice %150 {offsets = [0, 64], sizes = [8, 32], strides = [1, 1]} : vector<8x128xf32> to vector<8x32xf32>
    %154 = vector.extract_strided_slice %149 {offsets = [0, 96], sizes = [8, 32], strides = [1, 1]} : vector<8x128xf32> to vector<8x32xf32>
    %155 = arith.mulf %152, %138 : vector<8x32xf32>
    %156 = arith.mulf %151, %153 : vector<8x32xf32>
    %157 = arith.addf %155, %156 : vector<8x32xf32>
    %158 = math.tanh %157 : vector<8x32xf32>
    %159 = arith.mulf %154, %158 : vector<8x32xf32>
    %c56 = arith.constant 56 : index
    %c0_33 = arith.constant 0 : index
    %160 = vector.load %arg10[%c56, %c0_33] : memref<64x32xf32, #tpu.memory_space<vmem>>, vector<8x32xf32>
    tpu.vector_store %arg10[%c56, %c0_33], %159 {strides = array<i32>} : memref<64x32xf32, #tpu.memory_space<vmem>>, vector<8x32xf32>,
    %c0_34 = arith.constant 0 : index
    %c0_35 = arith.constant 0 : index
    %161 = vector.load %arg10[%c0_34, %c0_35] : memref<64x32xf32, #tpu.memory_space<vmem>>, vector<64x32xf32>
    %c0_36 = arith.constant 0 : index
    %c0_37 = arith.constant 0 : index
    %162 = vector.load %arg4[%c0_36, %c0_37] : memref<32x128xf32, #tpu.memory_space<vmem>>, vector<32x128xf32>
    %cst_38 = arith.constant dense<0.000000e+00> : vector<64x128xf32>
    %163 = tpu.matmul %161, %162, %cst_38 {dimension_numbers = #tpu.dot_dimension_numbers<[1], [0], [0], [1], [0, 0, 1, 1], [], []>} : vector<64x32xf32>, vector<32x128xf32>, vector<64x128xf32> -> vector<64x128xf32>
    %c0_39 = arith.constant 0 : index
    %c0_40 = arith.constant 0 : index
    %164 = vector.load %arg6[%c0_39, %c0_40] : memref<1x128xf32, #tpu.memory_space<vmem>>, vector<1x128xf32>
    %165 = vector.broadcast %164 : vector<1x128xf32> to vector<64x128xf32>
    %166 = arith.addf %163, %165 : vector<64x128xf32>
    %c0_41 = arith.constant 0 : index
    %c0_42 = arith.constant 0 : index
    %167 = vector.load %arg5[%c0_41, %c0_42] : memref<32x128xf32, #tpu.memory_space<vmem>>, vector<32x128xf32>
    %cst_43 = arith.constant 0.000000e+00 : f32
    %168 = vector.broadcast %cst_43 : f32 to vector<8x32xf32>
    %cst_44 = arith.constant 0.000000e+00 : f32
    %169 = vector.broadcast %cst_44 : f32 to vector<8x32xf32>
    %170 = vector.extract_strided_slice %166 {offsets = [0, 0], sizes = [8, 128], strides = [1, 1]} : vector<64x128xf32> to vector<8x128xf32>
    %cst_45 = arith.constant dense<0.000000e+00> : vector<8x128xf32>
    %171 = tpu.matmul %168, %167, %cst_45 {dimension_numbers = #tpu.dot_dimension_numbers<[1], [0], [0], [1], [0, 0, 1, 1], [], []>} : vector<8x32xf32>, vector<32x128xf32>, vector<8x128xf32> -> vector<8x128xf32>
    %172 = arith.addf %170, %171 : vector<8x128xf32>
    %173 = arith.negf %172 : vector<8x128xf32>
    %174 = math.exp %173 : vector<8x128xf32>
    %cst_46 = arith.constant 1.000000e+00 : f32
    %175 = vector.broadcast %cst_46 : f32 to vector<8x128xf32>
    %176 = arith.addf %175, %174 : vector<8x128xf32>
    %177 = arith.divf %175, %176 : vector<8x128xf32>
    %178 = math.tanh %172 : vector<8x128xf32>
    %179 = vector.extract_strided_slice %177 {offsets = [0, 0], sizes = [8, 32], strides = [1, 1]} : vector<8x128xf32> to vector<8x32xf32>
    %180 = vector.extract_strided_slice %177 {offsets = [0, 32], sizes = [8, 32], strides = [1, 1]} : vector<8x128xf32> to vector<8x32xf32>
    %181 = vector.extract_strided_slice %178 {offsets = [0, 64], sizes = [8, 32], strides = [1, 1]} : vector<8x128xf32> to vector<8x32xf32>
    %182 = vector.extract_strided_slice %177 {offsets = [0, 96], sizes = [8, 32], strides = [1, 1]} : vector<8x128xf32> to vector<8x32xf32>
    %183 = arith.mulf %180, %169 : vector<8x32xf32>
    %184 = arith.mulf %179, %181 : vector<8x32xf32>
    %185 = arith.addf %183, %184 : vector<8x32xf32>
    %186 = math.tanh %185 : vector<8x32xf32>
    %187 = arith.mulf %182, %186 : vector<8x32xf32>
    %188 = vector.extract_strided_slice %166 {offsets = [8, 0], sizes = [8, 128], strides = [1, 1]} : vector<64x128xf32> to vector<8x128xf32>
    %cst_47 = arith.constant dense<0.000000e+00> : vector<8x128xf32>
    %189 = tpu.matmul %187, %167, %cst_47 {dimension_numbers = #tpu.dot_dimension_numbers<[1], [0], [0], [1], [0, 0, 1, 1], [], []>} : vector<8x32xf32>, vector<32x128xf32>, vector<8x128xf32> -> vector<8x128xf32>
    %190 = arith.addf %188, %189 : vector<8x128xf32>
    %191 = arith.negf %190 : vector<8x128xf32>
    %192 = math.exp %191 : vector<8x128xf32>
    %cst_48 = arith.constant 1.000000e+00 : f32
    %193 = vector.broadcast %cst_48 : f32 to vector<8x128xf32>
    %194 = arith.addf %193, %192 : vector<8x128xf32>
    %195 = arith.divf %193, %194 : vector<8x128xf32>
    %196 = math.tanh %190 : vector<8x128xf32>
    %197 = vector.extract_strided_slice %195 {offsets = [0, 0], sizes = [8, 32], strides = [1, 1]} : vector<8x128xf32> to vector<8x32xf32>
    %198 = vector.extract_strided_slice %195 {offsets = [0, 32], sizes = [8, 32], strides = [1, 1]} : vector<8x128xf32> to vector<8x32xf32>
    %199 = vector.extract_strided_slice %196 {offsets = [0, 64], sizes = [8, 32], strides = [1, 1]} : vector<8x128xf32> to vector<8x32xf32>
    %200 = vector.extract_strided_slice %195 {offsets = [0, 96], sizes = [8, 32], strides = [1, 1]} : vector<8x128xf32> to vector<8x32xf32>
    %201 = arith.mulf %198, %185 : vector<8x32xf32>
    %202 = arith.mulf %197, %199 : vector<8x32xf32>
    %203 = arith.addf %201, %202 : vector<8x32xf32>
    %204 = math.tanh %203 : vector<8x32xf32>
    %205 = arith.mulf %200, %204 : vector<8x32xf32>
    %206 = vector.extract_strided_slice %166 {offsets = [16, 0], sizes = [8, 128], strides = [1, 1]} : vector<64x128xf32> to vector<8x128xf32>
    %cst_49 = arith.constant dense<0.000000e+00> : vector<8x128xf32>
    %207 = tpu.matmul %205, %167, %cst_49 {dimension_numbers = #tpu.dot_dimension_numbers<[1], [0], [0], [1], [0, 0, 1, 1], [], []>} : vector<8x32xf32>, vector<32x128xf32>, vector<8x128xf32> -> vector<8x128xf32>
    %208 = arith.addf %206, %207 : vector<8x128xf32>
    %209 = arith.negf %208 : vector<8x128xf32>
    %210 = math.exp %209 : vector<8x128xf32>
    %cst_50 = arith.constant 1.000000e+00 : f32
    %211 = vector.broadcast %cst_50 : f32 to vector<8x128xf32>
    %212 = arith.addf %211, %210 : vector<8x128xf32>
    %213 = arith.divf %211, %212 : vector<8x128xf32>
    %214 = math.tanh %208 : vector<8x128xf32>
    %215 = vector.extract_strided_slice %213 {offsets = [0, 0], sizes = [8, 32], strides = [1, 1]} : vector<8x128xf32> to vector<8x32xf32>
    %216 = vector.extract_strided_slice %213 {offsets = [0, 32], sizes = [8, 32], strides = [1, 1]} : vector<8x128xf32> to vector<8x32xf32>
    %217 = vector.extract_strided_slice %214 {offsets = [0, 64], sizes = [8, 32], strides = [1, 1]} : vector<8x128xf32> to vector<8x32xf32>
    %218 = vector.extract_strided_slice %213 {offsets = [0, 96], sizes = [8, 32], strides = [1, 1]} : vector<8x128xf32> to vector<8x32xf32>
    %219 = arith.mulf %216, %203 : vector<8x32xf32>
    %220 = arith.mulf %215, %217 : vector<8x32xf32>
    %221 = arith.addf %219, %220 : vector<8x32xf32>
    %222 = math.tanh %221 : vector<8x32xf32>
    %223 = arith.mulf %218, %222 : vector<8x32xf32>
    %224 = vector.extract_strided_slice %166 {offsets = [24, 0], sizes = [8, 128], strides = [1, 1]} : vector<64x128xf32> to vector<8x128xf32>
    %cst_51 = arith.constant dense<0.000000e+00> : vector<8x128xf32>
    %225 = tpu.matmul %223, %167, %cst_51 {dimension_numbers = #tpu.dot_dimension_numbers<[1], [0], [0], [1], [0, 0, 1, 1], [], []>} : vector<8x32xf32>, vector<32x128xf32>, vector<8x128xf32> -> vector<8x128xf32>
    %226 = arith.addf %224, %225 : vector<8x128xf32>
    %227 = arith.negf %226 : vector<8x128xf32>
    %228 = math.exp %227 : vector<8x128xf32>
    %cst_52 = arith.constant 1.000000e+00 : f32
    %229 = vector.broadcast %cst_52 : f32 to vector<8x128xf32>
    %230 = arith.addf %229, %228 : vector<8x128xf32>
    %231 = arith.divf %229, %230 : vector<8x128xf32>
    %232 = math.tanh %226 : vector<8x128xf32>
    %233 = vector.extract_strided_slice %231 {offsets = [0, 0], sizes = [8, 32], strides = [1, 1]} : vector<8x128xf32> to vector<8x32xf32>
    %234 = vector.extract_strided_slice %231 {offsets = [0, 32], sizes = [8, 32], strides = [1, 1]} : vector<8x128xf32> to vector<8x32xf32>
    %235 = vector.extract_strided_slice %232 {offsets = [0, 64], sizes = [8, 32], strides = [1, 1]} : vector<8x128xf32> to vector<8x32xf32>
    %236 = vector.extract_strided_slice %231 {offsets = [0, 96], sizes = [8, 32], strides = [1, 1]} : vector<8x128xf32> to vector<8x32xf32>
    %237 = arith.mulf %234, %221 : vector<8x32xf32>
    %238 = arith.mulf %233, %235 : vector<8x32xf32>
    %239 = arith.addf %237, %238 : vector<8x32xf32>
    %240 = math.tanh %239 : vector<8x32xf32>
    %241 = arith.mulf %236, %240 : vector<8x32xf32>
    %242 = vector.extract_strided_slice %166 {offsets = [32, 0], sizes = [8, 128], strides = [1, 1]} : vector<64x128xf32> to vector<8x128xf32>
    %cst_53 = arith.constant dense<0.000000e+00> : vector<8x128xf32>
    %243 = tpu.matmul %241, %167, %cst_53 {dimension_numbers = #tpu.dot_dimension_numbers<[1], [0], [0], [1], [0, 0, 1, 1], [], []>} : vector<8x32xf32>, vector<32x128xf32>, vector<8x128xf32> -> vector<8x128xf32>
    %244 = arith.addf %242, %243 : vector<8x128xf32>
    %245 = arith.negf %244 : vector<8x128xf32>
    %246 = math.exp %245 : vector<8x128xf32>
    %cst_54 = arith.constant 1.000000e+00 : f32
    %247 = vector.broadcast %cst_54 : f32 to vector<8x128xf32>
    %248 = arith.addf %247, %246 : vector<8x128xf32>
    %249 = arith.divf %247, %248 : vector<8x128xf32>
    %250 = math.tanh %244 : vector<8x128xf32>
    %251 = vector.extract_strided_slice %249 {offsets = [0, 0], sizes = [8, 32], strides = [1, 1]} : vector<8x128xf32> to vector<8x32xf32>
    %252 = vector.extract_strided_slice %249 {offsets = [0, 32], sizes = [8, 32], strides = [1, 1]} : vector<8x128xf32> to vector<8x32xf32>
    %253 = vector.extract_strided_slice %250 {offsets = [0, 64], sizes = [8, 32], strides = [1, 1]} : vector<8x128xf32> to vector<8x32xf32>
    %254 = vector.extract_strided_slice %249 {offsets = [0, 96], sizes = [8, 32], strides = [1, 1]} : vector<8x128xf32> to vector<8x32xf32>
    %255 = arith.mulf %252, %239 : vector<8x32xf32>
    %256 = arith.mulf %251, %253 : vector<8x32xf32>
    %257 = arith.addf %255, %256 : vector<8x32xf32>
    %258 = math.tanh %257 : vector<8x32xf32>
    %259 = arith.mulf %254, %258 : vector<8x32xf32>
    %260 = vector.extract_strided_slice %166 {offsets = [40, 0], sizes = [8, 128], strides = [1, 1]} : vector<64x128xf32> to vector<8x128xf32>
    %cst_55 = arith.constant dense<0.000000e+00> : vector<8x128xf32>
    %261 = tpu.matmul %259, %167, %cst_55 {dimension_numbers = #tpu.dot_dimension_numbers<[1], [0], [0], [1], [0, 0, 1, 1], [], []>} : vector<8x32xf32>, vector<32x128xf32>, vector<8x128xf32> -> vector<8x128xf32>
    %262 = arith.addf %260, %261 : vector<8x128xf32>
    %263 = arith.negf %262 : vector<8x128xf32>
    %264 = math.exp %263 : vector<8x128xf32>
    %cst_56 = arith.constant 1.000000e+00 : f32
    %265 = vector.broadcast %cst_56 : f32 to vector<8x128xf32>
    %266 = arith.addf %265, %264 : vector<8x128xf32>
    %267 = arith.divf %265, %266 : vector<8x128xf32>
    %268 = math.tanh %262 : vector<8x128xf32>
    %269 = vector.extract_strided_slice %267 {offsets = [0, 0], sizes = [8, 32], strides = [1, 1]} : vector<8x128xf32> to vector<8x32xf32>
    %270 = vector.extract_strided_slice %267 {offsets = [0, 32], sizes = [8, 32], strides = [1, 1]} : vector<8x128xf32> to vector<8x32xf32>
    %271 = vector.extract_strided_slice %268 {offsets = [0, 64], sizes = [8, 32], strides = [1, 1]} : vector<8x128xf32> to vector<8x32xf32>
    %272 = vector.extract_strided_slice %267 {offsets = [0, 96], sizes = [8, 32], strides = [1, 1]} : vector<8x128xf32> to vector<8x32xf32>
    %273 = arith.mulf %270, %257 : vector<8x32xf32>
    %274 = arith.mulf %269, %271 : vector<8x32xf32>
    %275 = arith.addf %273, %274 : vector<8x32xf32>
    %276 = math.tanh %275 : vector<8x32xf32>
    %277 = arith.mulf %272, %276 : vector<8x32xf32>
    %278 = vector.extract_strided_slice %166 {offsets = [48, 0], sizes = [8, 128], strides = [1, 1]} : vector<64x128xf32> to vector<8x128xf32>
    %cst_57 = arith.constant dense<0.000000e+00> : vector<8x128xf32>
    %279 = tpu.matmul %277, %167, %cst_57 {dimension_numbers = #tpu.dot_dimension_numbers<[1], [0], [0], [1], [0, 0, 1, 1], [], []>} : vector<8x32xf32>, vector<32x128xf32>, vector<8x128xf32> -> vector<8x128xf32>
    %280 = arith.addf %278, %279 : vector<8x128xf32>
    %281 = arith.negf %280 : vector<8x128xf32>
    %282 = math.exp %281 : vector<8x128xf32>
    %cst_58 = arith.constant 1.000000e+00 : f32
    %283 = vector.broadcast %cst_58 : f32 to vector<8x128xf32>
    %284 = arith.addf %283, %282 : vector<8x128xf32>
    %285 = arith.divf %283, %284 : vector<8x128xf32>
    %286 = math.tanh %280 : vector<8x128xf32>
    %287 = vector.extract_strided_slice %285 {offsets = [0, 0], sizes = [8, 32], strides = [1, 1]} : vector<8x128xf32> to vector<8x32xf32>
    %288 = vector.extract_strided_slice %285 {offsets = [0, 32], sizes = [8, 32], strides = [1, 1]} : vector<8x128xf32> to vector<8x32xf32>
    %289 = vector.extract_strided_slice %286 {offsets = [0, 64], sizes = [8, 32], strides = [1, 1]} : vector<8x128xf32> to vector<8x32xf32>
    %290 = vector.extract_strided_slice %285 {offsets = [0, 96], sizes = [8, 32], strides = [1, 1]} : vector<8x128xf32> to vector<8x32xf32>
    %291 = arith.mulf %288, %275 : vector<8x32xf32>
    %292 = arith.mulf %287, %289 : vector<8x32xf32>
    %293 = arith.addf %291, %292 : vector<8x32xf32>
    %294 = math.tanh %293 : vector<8x32xf32>
    %295 = arith.mulf %290, %294 : vector<8x32xf32>
    %296 = vector.extract_strided_slice %166 {offsets = [56, 0], sizes = [8, 128], strides = [1, 1]} : vector<64x128xf32> to vector<8x128xf32>
    %cst_59 = arith.constant dense<0.000000e+00> : vector<8x128xf32>
    %297 = tpu.matmul %295, %167, %cst_59 {dimension_numbers = #tpu.dot_dimension_numbers<[1], [0], [0], [1], [0, 0, 1, 1], [], []>} : vector<8x32xf32>, vector<32x128xf32>, vector<8x128xf32> -> vector<8x128xf32>
    %298 = arith.addf %296, %297 : vector<8x128xf32>
    %299 = arith.negf %298 : vector<8x128xf32>
    %300 = math.exp %299 : vector<8x128xf32>
    %cst_60 = arith.constant 1.000000e+00 : f32
    %301 = vector.broadcast %cst_60 : f32 to vector<8x128xf32>
    %302 = arith.addf %301, %300 : vector<8x128xf32>
    %303 = arith.divf %301, %302 : vector<8x128xf32>
    %304 = math.tanh %298 : vector<8x128xf32>
    %305 = vector.extract_strided_slice %303 {offsets = [0, 0], sizes = [8, 32], strides = [1, 1]} : vector<8x128xf32> to vector<8x32xf32>
    %306 = vector.extract_strided_slice %303 {offsets = [0, 32], sizes = [8, 32], strides = [1, 1]} : vector<8x128xf32> to vector<8x32xf32>
    %307 = vector.extract_strided_slice %304 {offsets = [0, 64], sizes = [8, 32], strides = [1, 1]} : vector<8x128xf32> to vector<8x32xf32>
    %308 = vector.extract_strided_slice %303 {offsets = [0, 96], sizes = [8, 32], strides = [1, 1]} : vector<8x128xf32> to vector<8x32xf32>
    %309 = arith.mulf %306, %293 : vector<8x32xf32>
    %310 = arith.mulf %305, %307 : vector<8x32xf32>
    %311 = arith.addf %309, %310 : vector<8x32xf32>
    %312 = math.tanh %311 : vector<8x32xf32>
    %313 = arith.mulf %308, %312 : vector<8x32xf32>
    %c0_61 = arith.constant 0 : index
    %c0_62 = arith.constant 0 : index
    %314 = vector.load %arg7[%c0_61, %c0_62] : memref<32x1xf32, #tpu.memory_space<vmem>>, vector<32x1xf32>
    %cst_63 = arith.constant dense<0.000000e+00> : vector<8x1xf32>
    %315 = tpu.matmul %313, %314, %cst_63 {dimension_numbers = #tpu.dot_dimension_numbers<[1], [0], [0], [1], [0, 0, 1, 1], [], []>} : vector<8x32xf32>, vector<32x1xf32>, vector<8x1xf32> -> vector<8x1xf32>
    %c0_64 = arith.constant 0 : index
    %c0_65 = arith.constant 0 : index
    %316 = vector.load %arg8[%c0_64, %c0_65] : memref<1x1xf32, #tpu.memory_space<vmem>>, vector<1x1xf32>
    %317 = vector.broadcast %316 : vector<1x1xf32> to vector<8x1xf32>
    %318 = arith.addf %315, %317 : vector<8x1xf32>
    %c0_66 = arith.constant 0 : index
    %c0_67 = arith.constant 0 : index
    %319 = vector.load %arg9[%c0_66, %c0_67] : memref<8x1xf32, #tpu.memory_space<vmem>>, vector<8x1xf32>
    tpu.vector_store %arg9[%c0_66, %c0_67], %318 {strides = array<i32>} : memref<8x1xf32, #tpu.memory_space<vmem>>, vector<8x1xf32>,
    return
  }
}

</mosaic_0001>

<bundles_post_ra>
// kernel: lstm_model_forward.1
= control target key start
LH: loop header
LB: loop body
LE: loop exit
PB: predicated region body
PF: predicated region fallthrough
CT: control target
= control target key end

     0   :  { %vm75_vm0 = vcmask 1043456   ;;  %vm50_vm1 = vcmask 31744   ;;  %v2555_v0 = vmov 0.0   ;;  %vm2556_vm2 = vmmov 0   ;;  %s2557_s23 = smov 64   ;;  %s3034_s1 = inlined_call_operand.vmem [shape: f32[4,128], index: 1, kind: input, shape index: {}]   ;;  %s3035_s2 = inlined_call_operand.vmem [shape: f32[32,128], index: 2, kind: input, shape index: {}]   ;;  %s3036_s0 = inlined_call_operand.vmem [shape: f32[64,4], index: 0, kind: input, shape index: {}]   ;;  %s3037_s3 = inlined_call_operand.vmem [shape: f32[1,128], index: 3, kind: input, shape index: {}]   ;;  %s3038_s4 = inlined_call_operand.vmem [shape: f32[32,128], index: 4, kind: input, shape index: {}]   ;;  %s3039_s5 = inlined_call_operand.vmem [shape: f32[32,128], index: 5, kind: input, shape index: {}]   ;;  %s3040_s6 = inlined_call_operand.vmem [shape: f32[1,128], index: 6, kind: input, shape index: {}]   ;;  %s3041_s7 = inlined_call_operand.vmem [shape: f32[32,1], index: 7, kind: input, shape index: {}]   ;;  %s3042_s8 = inlined_call_operand.<no memory space> [shape: f32[1,1], index: 8, kind: input, shape index: {}]   ;;  %s3043_s9 = inlined_call_operand.vmem [shape: f32[8,1], index: 9, kind: output, shape index: {}]  }
   0x1   :  { %2216 = vmatprep.subr.mxu1 %v2555_v0  ;;  %v42_v1 = vld [vmem:[%s3034_s1] sm:$0xf]  ;;  %v2616_v2 = vld [vmem:[%s3035_s2 + $0x18] sm:$0xff]  ;;  %2224 = vmatprep.mubr.msk.f32.mxu1 %vm2556_vm2, %v2555_v0  ;;  %v35_v4 = vld [vmem:[%s3036_s0 + $0x8] sm:$0xff]  ;;  %vm188_vm3 = vcmask 261120   ;;  %vm2039_vm4 = vcmask 7168  }
   0x2   :  { %v34_v3 = vld [vmem:[%s3036_s0] sm:$0xff]  ;;  %2202 = vmatprep.subr.msk.mxu0 %vm75_vm0, %v42_v1  ;;  %2217 = vmatpush3.msra.mxu1 %v2616_v2  ;;  %v2630_v5 = vld [vmem:[%s3035_s2 + $0x10] sm:$0xff]  ;;  %v2638_v6 = vld [vmem:[%s3035_s2 + $0x8] sm:$0xff] }
   0x3   :  { %2203 = vmatpush3.msk.msra.mxu0 %vm75_vm0, %v42_v1  ;;  %2204 = vmatprep.mubr.msk.f32.mxu0 %vm50_vm1, %v34_v3  ;;  %v2646_v7 = vld [vmem:[%s3035_s2] sm:$0xff]  ;;  %v36_v43 = vld [vmem:[%s3036_s0 + $0x10] sm:$0xff]  ;;  %v37_v44 = vld [vmem:[%s3036_s0 + $0x18] sm:$0xff] }
   0x4   :  { %2218 = vmatprep.subr.mxu1 %v2555_v0  ;;  %2205 = vmatmul.mubr.msk.f32.vlgmr.msra.gmra.mxu0 %vm50_vm1, %v35_v4  ;;  %v2674_v9 = vld [vmem:[%s3037_s3] ss:$0 sm:$0xff]  ;;  %s2558_s3 = smov 32   ;;  %v39_v46 = vld [vmem:[%s3036_s0 + $0x28] sm:$0xff]  ;;  %v40_v47 = vld [vmem:[%s3036_s0 + $0x30] sm:$0xff] }
   0x5   :  { %2219 = vmatpush3.msra.mxu1 %v2630_v5  ;;  %2238 = vmatprep.subr.mxu0 %v2555_v0  ;;  %v38_v45 = vld [vmem:[%s3036_s0 + $0x20] sm:$0xff]  ;;  %v41_v48 = vld [vmem:[%s3036_s0 + $0x38] sm:$0xff] }
   0x6   :  { %2220 = vmatprep.subr.mxu1 %v2555_v0  ;;  %2239 = vmatpush3.msra.mxu0 %v2616_v2 }
   0x7   :  { %2221 = vmatpush3.msra.mxu1 %v2638_v6  ;;  %2240 = vmatprep.subr.mxu0 %v2555_v0 }
   0x8   :  { %2222 = vmatprep.subr.mxu1 %v2555_v0  ;;  %2241 = vmatpush3.msra.mxu0 %v2630_v5 }
   0x9   :  { %2223 = vmatpush3.msra.mxu1 %v2646_v7  ;;  %2242 = vmatprep.subr.mxu0 %v2555_v0 }
   0xa   :  { %2225 = vmatmul.mubr.f32.vlgmr.msra.gmra.mxu1 %v2555_v0  ;;  %2227 = vmatprep.subr.mxu1 %v2555_v0 }
   0xb   :  { %2228 = vmatpush3.msra.mxu1 %v2616_v2  ;;  %2235 = vmatprep.mubr.msk.f32.mxu1 %vm2556_vm2, %v2555_v0 }
   0xc   :  { %2229 = vmatprep.subr.mxu1 %v2555_v0  ;;  %2243 = vmatpush3.msra.mxu0 %v2638_v6 }
   0xd   :  { %2230 = vmatpush3.msra.mxu1 %v2630_v5  ;;  %2244 = vmatprep.subr.mxu0 %v2555_v0 }
   0xe   :  { %2231 = vmatprep.subr.mxu1 %v2555_v0  ;;  %2245 = vmatpush3.msra.mxu0 %v2646_v7 }
   0xf   :  { %2232 = vmatpush3.msra.mxu1 %v2638_v6  ;;  %2260 = vmatprep.subr.mxu0 %v2555_v0 }
  0x10   :  { %2233 = vmatprep.subr.mxu1 %v2555_v0  ;;  %2207 = vmatprep.mubr.msk.f32.mxu0 %vm50_vm1, %v36_v43 }
  0x11   :  { %2234 = vmatpush3.msra.mxu1 %v2646_v7  ;;  %2208 = vmatmul.mubr.msk.f32.gmra.mxu0 %vm50_vm1, %v37_v44 }
  0x12   :  { %2249 = vmatprep.subr.mxu1 %v2555_v0  ;;  %2210 = vmatprep.mubr.msk.f32.mxu0 %vm50_vm1, %v38_v45 }
  0x15   :  { %2211 = vmatmul.mubr.msk.f32.gmra.mxu0 %vm50_vm1, %v39_v46 }
  0x16   :  { %2213 = vmatprep.mubr.msk.f32.mxu0 %vm50_vm1, %v40_v47 }
  0x19   :  { %2214 = vmatmul.mubr.msk.f32.gmra.mxu0 %vm50_vm1, %v41_v48 }
  0x1a   :  { %2246 = vmatprep.mubr.msk.f32.mxu0 %vm2556_vm2, %v2555_v0 }
  0xc4   :  { %v2206_v8 = vpop.f32.mrf.mxu0 }
  0xc5   :  { %v151_v29 = vadd.f32 %v2206_v8, %v2674_v9 }
  0xc6   :  { %v145_v10 = vpop.f32.mrf.mxu0 }
  0xc7   :  { %v146_v11 = vadd.f32 %v2674_v9, %v145_v10 }
  0xca   :  { %v258_v12 = vpop.f32.mrf.mxu1 }
  0xcb   :  { %v262_v13 = vadd.f32 %v258_v12, %v146_v11 }
  0xcc   :  { %v2226_v14 = vpop.f32.mrf.mxu1 }
  0xcd   :  { %2427 = vtanh.f32 %v262_v13  ;;  %v2055_v16 = vmul.f32 -1.442695, %v262_v13 }
  0xcf   :  { %2429 = vpow2.f32 %v2055_v16 }
  0xd1   :  { %v2209_v53 = vpop.f32.mrf.mxu0 }
  0xd3   :  { %v155_v54 = vpop.f32.mrf.mxu0 }
  0xd4   :  { %v156_v59 = vadd.f32 %v2674_v9, %v155_v54 }
  0xd5   :  { %v2736_v55 = vpop.f32.mrf.mxu0 }
  0xd7   :  { %v2738_v56 = vpop.f32.mrf.mxu0 }
  0xd9   :  { %v2740_v57 = vpop.f32.mrf.mxu0 }
  0xda   :  { %v2428_v15 = vpop.eup %2427 }
  0xdb   :  { %272 = vrot.lane.b32.xlu0 %v2428_v15, %s2557_s23  ;;  %v2742_v58 = vpop.f32.mrf.mxu0 }
  0xdc   :  { %v2430_v17 = vpop.eup %2429 }
  0xdd   :  { %v266_v18 = vadd.f32 1.0, %v2430_v17 }
  0xdf   :  { %2431 = vrcp.f32 %v266_v18 }
  0xec   :  { %v2432_v19 = vpop.eup %2431 }
  0xed   :  { %v270_v22 = vmul.f32 0.0, %v2432_v19 }
 0x14d   :  { %v273_v20 = vpop.permute.xlu0 %272 }
 0x14e   :  { %v275_v21 = vmul.f32 %v2432_v19, %v273_v20 }
 0x150   :  { %277 = vrot.lane.b32.xlu0 %v275_v21, %s2558_s3 }
 0x1c2   :  { %v278_v23 = vpop.permute.xlu0 %277 }
 0x1c3   :  { %v280_v24 = vadd.f32 %v278_v23, %v270_v22 }
 0x1c5   :  { %2433 = vtanh.f32 %v280_v24 }
 0x1d2   :  { %v2434_v25 = vpop.eup %2433 }
 0x1d3   :  { %283 = vrot.lane.b32.xlu1 %v2434_v25, %s2557_s23 }
 0x245   :  { %v284_v26 = vpop.permute.xlu1 %283 }
 0x246   :  { %v286_v27 = vmul.f32 %v2432_v19, %v284_v26  ;;  %v161_v19 = vadd.f32 %v2209_v53, %v2674_v9 }
 0x248   :  { %288 = vrot.lane.b32.xlu1 %v286_v27, %s2558_s3 }
 0x2ba   :  { %v289_v28 = vpop.permute.xlu1 %288 }
 0x2bb   :  { %291 = vst.msk [vmem:[#allocation2] sm:$0xff] %vm188_vm3, %v289_v28  ;;  %2236 = vmatmul.mubr.msk.f32.vlgmr.msra.gmra.mxu1 %vm188_vm3, %v289_v28 }
 0x2bc   :  { %2250 = vmatpush3.msra.mxu1 %v2616_v2  ;;  %2257 = vmatprep.mubr.msk.f32.mxu1 %vm2556_vm2, %v2555_v0 }
 0x2bd   :  { %2251 = vmatprep.subr.mxu1 %v2555_v0 }
 0x2be   :  { %2252 = vmatpush3.msra.mxu1 %v2630_v5 }
 0x2bf   :  { %2253 = vmatprep.subr.mxu1 %v2555_v0 }
 0x2c0   :  { %2254 = vmatpush3.msra.mxu1 %v2638_v6 }
 0x2c1   :  { %2255 = vmatprep.subr.mxu1 %v2555_v0 }
 0x2c2   :  { %2256 = vmatpush3.msra.mxu1 %v2646_v7 }
 0x2c3   :  { %2271 = vmatprep.subr.mxu1 %v2555_v0 }
 0x37b   :  { %v360_v30 = vpop.f32.mrf.mxu1 }
 0x37c   :  { %v364_v31 = vadd.f32 %v360_v30, %v151_v29 }
 0x37d   :  { %v2237_v32 = vpop.f32.mrf.mxu1 }
 0x37e   :  { %2435 = vtanh.f32 %v364_v31  ;;  %v2057_v34 = vmul.f32 -1.442695, %v364_v31 }
 0x380   :  { %2437 = vpow2.f32 %v2057_v34 }
 0x38b   :  { %v2436_v33 = vpop.eup %2435 }
 0x38c   :  { %374 = vrot.lane.b32.xlu0 %v2436_v33, %s2557_s23 }
 0x38d   :  { %v2438_v35 = vpop.eup %2437 }
 0x38e   :  { %v368_v36 = vadd.f32 1.0, %v2438_v35 }
 0x390   :  { %2439 = vrcp.f32 %v368_v36 }
 0x39d   :  { %v2440_v37 = vpop.eup %2439 }
 0x39e   :  { %v372_v40 = vmul.f32 %v2440_v37, %v280_v24 }
 0x3fe   :  { %v375_v38 = vpop.permute.xlu0 %374 }
 0x3ff   :  { %v377_v39 = vmul.f32 %v2440_v37, %v375_v38 }
 0x401   :  { %379 = vrot.lane.b32.xlu1 %v377_v39, %s2558_s3 }
 0x473   :  { %v380_v41 = vpop.permute.xlu1 %379 }
 0x474   :  { %v382_v42 = vadd.f32 %v380_v41, %v372_v40 }
 0x476   :  { %2441 = vtanh.f32 %v382_v42 }
 0x483   :  { %v2442_v49 = vpop.eup %2441 }
 0x484   :  { %385 = vrot.lane.b32.xlu0 %v2442_v49, %s2557_s23 }
 0x4f6   :  { %v386_v50 = vpop.permute.xlu0 %385 }
 0x4f7   :  { %v388_v51 = vmul.f32 %v2440_v37, %v386_v50  ;;  %v166_v37 = vadd.f32 %v2674_v9, %v2738_v56 }
 0x4f9   :  { %390 = vrot.lane.b32.xlu1 %v388_v51, %s2558_s3 }
 0x56b   :  { %v391_v52 = vpop.permute.xlu1 %390 }
 0x56c   :  { %393 = vst.msk [vmem:[#allocation2 + $0x8] sm:$0xff] %vm188_vm3, %v391_v52  ;;  %2247 = vmatmul.mubr.msk.f32.vlgmr.msra.gmra.mxu0 %vm188_vm3, %v391_v52 }
 0x56d   :  { %2261 = vmatpush3.msra.mxu0 %v2616_v2  ;;  %2268 = vmatprep.mubr.msk.f32.mxu0 %vm2556_vm2, %v2555_v0 }
 0x56e   :  { %2262 = vmatprep.subr.mxu0 %v2555_v0 }
 0x56f   :  { %2263 = vmatpush3.msra.mxu0 %v2630_v5 }
 0x570   :  { %2264 = vmatprep.subr.mxu0 %v2555_v0 }
 0x571   :  { %2265 = vmatpush3.msra.mxu0 %v2638_v6 }
 0x572   :  { %2266 = vmatprep.subr.mxu0 %v2555_v0 }
 0x573   :  { %2267 = vmatpush3.msra.mxu0 %v2646_v7 }
 0x574   :  { %2282 = vmatprep.subr.mxu0 %v2555_v0 }
 0x62c   :  { %v462_v60 = vpop.f32.mrf.mxu0 }
 0x62d   :  { %v466_v61 = vadd.f32 %v462_v60, %v156_v59 }
 0x62e   :  { %v2248_v62 = vpop.f32.mrf.mxu0 }
 0x62f   :  { %2443 = vtanh.f32 %v466_v61  ;;  %v2059_v1 = vmul.f32 -1.442695, %v466_v61 }
 0x631   :  { %2445 = vpow2.f32 %v2059_v1 }
 0x63c   :  { %v2444_v63 = vpop.eup %2443 }
 0x63d   :  { %476 = vrot.lane.b32.xlu0 %v2444_v63, %s2557_s23 }
 0x63e   :  { %v2446_v3 = vpop.eup %2445 }
 0x63f   :  { %v470_v4 = vadd.f32 1.0, %v2446_v3 }
 0x641   :  { %2447 = vrcp.f32 %v470_v4 }
 0x64e   :  { %v2448_v8 = vpop.eup %2447 }
 0x64f   :  { %v474_v12 = vmul.f32 %v2448_v8, %v382_v42 }
 0x6af   :  { %v477_v10 = vpop.permute.xlu0 %476 }
 0x6b0   :  { %v479_v11 = vmul.f32 %v2448_v8, %v477_v10 }
 0x6b2   :  { %481 = vrot.lane.b32.xlu1 %v479_v11, %s2558_s3 }
 0x724   :  { %v482_v13 = vpop.permute.xlu1 %481 }
 0x725   :  { %v484_v14 = vadd.f32 %v482_v13, %v474_v12 }
 0x727   :  { %2449 = vtanh.f32 %v484_v14 }
 0x734   :  { %v2450_v15 = vpop.eup %2449 }
 0x735   :  { %487 = vrot.lane.b32.xlu0 %v2450_v15, %s2557_s23  ;;  %v1006_v15 = vld [vmem:[#allocation2] sm:$0xff] }
 0x7a7   :  { %v488_v16 = vpop.permute.xlu0 %487 }
 0x7a8   :  { %v490_v17 = vmul.f32 %v2448_v8, %v488_v16  ;;  %v1017_v8 = vld [vmem:[%s3038_s4 + $0x18] sm:$0xff]  ;;  %v1015_v16 = vld [vmem:[%s3038_s4 + $0x8] sm:$0xff] }
 0x7aa   :  { %492 = vrot.lane.b32.xlu1 %v490_v17, %s2558_s3  ;;  %v1014_v17 = vld [vmem:[%s3038_s4] sm:$0xff] }
 0x81c   :  { %v493_v18 = vpop.permute.xlu1 %492 }
 0x81d   :  { %495 = vst.msk [vmem:[#allocation2 + $0x10] sm:$0xff] %vm188_vm3, %v493_v18  ;;  %2258 = vmatmul.mubr.msk.f32.vlgmr.msra.gmra.mxu1 %vm188_vm3, %v493_v18  ;;  %v1007_v18 = vld [vmem:[#allocation2 + $0x8] sm:$0xff] }
 0x81e   :  { %2272 = vmatpush3.msra.mxu1 %v2616_v2  ;;  %2279 = vmatprep.mubr.msk.f32.mxu1 %vm2556_vm2, %v2555_v0 }
 0x81f   :  { %2273 = vmatprep.subr.mxu1 %v2555_v0 }
 0x820   :  { %2274 = vmatpush3.msra.mxu1 %v2630_v5 }
 0x821   :  { %2275 = vmatprep.subr.mxu1 %v2555_v0 }
 0x822   :  { %2276 = vmatpush3.msra.mxu1 %v2638_v6 }
 0x823   :  { %2277 = vmatprep.subr.mxu1 %v2555_v0 }
 0x824   :  { %2278 = vmatpush3.msra.mxu1 %v2646_v7 }
 0x825   :  { %2293 = vmatprep.subr.mxu1 %v2555_v0 }
 0x8dd   :  { %v564_v20 = vpop.f32.mrf.mxu1 }
 0x8de   :  { %v568_v21 = vadd.f32 %v564_v20, %v161_v19  ;;  %v1008_v19 = vld [vmem:[#allocation2 + $0x10] sm:$0xff] }
 0x8df   :  { %v2259_v22 = vpop.f32.mrf.mxu1 }
 0x8e0   :  { %2451 = vtanh.f32 %v568_v21  ;;  %v2061_v24 = vmul.f32 -1.442695, %v568_v21 }
 0x8e2   :  { %2453 = vpow2.f32 %v2061_v24 }
 0x8ed   :  { %v2452_v23 = vpop.eup %2451 }
 0x8ee   :  { %578 = vrot.lane.b32.xlu0 %v2452_v23, %s2557_s23  ;;  %v176_v23 = vadd.f32 %v2674_v9, %v2742_v58 }
 0x8ef   :  { %v2454_v25 = vpop.eup %2453 }
 0x8f0   :  { %v572_v26 = vadd.f32 1.0, %v2454_v25 }
 0x8f2   :  { %2455 = vrcp.f32 %v572_v26 }
 0x8ff   :  { %v2456_v27 = vpop.eup %2455 }
 0x900   :  { %v576_v30 = vmul.f32 %v2456_v27, %v484_v14  ;;  %v1016_v14 = vld [vmem:[%s3038_s4 + $0x10] sm:$0xff] }
 0x960   :  { %v579_v28 = vpop.permute.xlu0 %578 }
 0x961   :  { %v581_v29 = vmul.f32 %v2456_v27, %v579_v28 }
 0x963   :  { %583 = vrot.lane.b32.xlu1 %v581_v29, %s2558_s3 }
 0x9d5   :  { %v584_v31 = vpop.permute.xlu1 %583 }
 0x9d6   :  { %v586_v32 = vadd.f32 %v584_v31, %v576_v30 }
 0x9d8   :  { %2457 = vtanh.f32 %v586_v32 }
 0x9e5   :  { %v2458_v33 = vpop.eup %2457 }
 0x9e6   :  { %589 = vrot.lane.b32.xlu0 %v2458_v33, %s2557_s23 }
 0xa58   :  { %v590_v34 = vpop.permute.xlu0 %589 }
 0xa59   :  { %v592_v35 = vmul.f32 %v2456_v27, %v590_v34 }
 0xa5b   :  { %594 = vrot.lane.b32.xlu1 %v592_v35, %s2558_s3 }
 0xacd   :  { %v595_v36 = vpop.permute.xlu1 %594 }
 0xace   :  { %597 = vst.msk [vmem:[#allocation2 + $0x18] sm:$0xff] %vm188_vm3, %v595_v36  ;;  %2269 = vmatmul.mubr.msk.f32.vlgmr.msra.gmra.mxu0 %vm188_vm3, %v595_v36 }
 0xacf   :  { %2283 = vmatpush3.msra.mxu0 %v2616_v2  ;;  %2290 = vmatprep.mubr.msk.f32.mxu0 %vm2556_vm2, %v2555_v0 }
 0xad0   :  { %2284 = vmatprep.subr.mxu0 %v2555_v0 }
 0xad1   :  { %2285 = vmatpush3.msra.mxu0 %v2630_v5 }
 0xad2   :  { %2286 = vmatprep.subr.mxu0 %v2555_v0 }
 0xad3   :  { %2287 = vmatpush3.msra.mxu0 %v2638_v6 }
 0xad4   :  { %2288 = vmatprep.subr.mxu0 %v2555_v0 }
 0xad5   :  { %2289 = vmatpush3.msra.mxu0 %v2646_v7  ;;  %v1009_v20 = vld [vmem:[#allocation2 + $0x18] sm:$0xff] }
 0xad6   :  { %2304 = vmatprep.subr.mxu0 %v1017_v8 }
 0xb8e   :  { %v666_v38 = vpop.f32.mrf.mxu0 }
 0xb8f   :  { %v670_v39 = vadd.f32 %v666_v38, %v166_v37  ;;  %v2833_v37 = vld [vmem:[%s3039_s5 + $0x18] sm:$0xff]  ;;  %v2839_v38 = vld [vmem:[%s3039_s5 + $0x10] sm:$0xff] }
 0xb90   :  { %v2270_v40 = vpop.f32.mrf.mxu0 }
 0xb91   :  { %2459 = vtanh.f32 %v670_v39  ;;  %v2063_v42 = vmul.f32 -1.442695, %v670_v39  ;;  %v2846_v39 = vld [vmem:[%s3039_s5 + $0x8] sm:$0xff]  ;;  %v2853_v40 = vld [vmem:[%s3039_s5] sm:$0xff] }
 0xb93   :  { %2461 = vpow2.f32 %v2063_v42 }
 0xb9e   :  { %v2460_v41 = vpop.eup %2459 }
 0xb9f   :  { %680 = vrot.lane.b32.xlu0 %v2460_v41, %s2557_s23 }
 0xba0   :  { %v2462_v43 = vpop.eup %2461 }
 0xba1   :  { %v674_v44 = vadd.f32 1.0, %v2462_v43 }
 0xba3   :  { %2463 = vrcp.f32 %v674_v44 }
 0xbb0   :  { %v2464_v45 = vpop.eup %2463 }
 0xbb1   :  { %v678_v48 = vmul.f32 %v2464_v45, %v586_v32 }
 0xc11   :  { %v681_v46 = vpop.permute.xlu0 %680 }
 0xc12   :  { %v683_v47 = vmul.f32 %v2464_v45, %v681_v46 }
 0xc14   :  { %685 = vrot.lane.b32.xlu1 %v683_v47, %s2558_s3 }
 0xc86   :  { %v686_v49 = vpop.permute.xlu1 %685 }
 0xc87   :  { %v688_v50 = vadd.f32 %v686_v49, %v678_v48 }
 0xc89   :  { %2465 = vtanh.f32 %v688_v50 }
 0xc96   :  { %v2466_v51 = vpop.eup %2465 }
 0xc97   :  { %691 = vrot.lane.b32.xlu0 %v2466_v51, %s2557_s23  ;;  %v2890_v51 = vld [vmem:[%s3040_s6] ss:$0 sm:$0xff] }
 0xd09   :  { %v692_v52 = vpop.permute.xlu0 %691 }
 0xd0a   :  { %v694_v53 = vmul.f32 %v2464_v45, %v692_v52  ;;  %v181_v45 = vadd.f32 %v2740_v57, %v2674_v9 }
 0xd0c   :  { %696 = vrot.lane.b32.xlu1 %v694_v53, %s2558_s3 }
 0xd7e   :  { %v697_v54 = vpop.permute.xlu1 %696 }
 0xd7f   :  { %699 = vst.msk [vmem:[#allocation2 + $0x20] sm:$0xff] %vm188_vm3, %v697_v54  ;;  %2280 = vmatmul.mubr.msk.f32.vlgmr.msra.gmra.mxu1 %vm188_vm3, %v697_v54 }
 0xd80   :  { %2294 = vmatpush3.msra.mxu1 %v2616_v2  ;;  %2301 = vmatprep.mubr.msk.f32.mxu1 %vm2556_vm2, %v2555_v0  ;;  %v171_v2 = vadd.f32 %v2736_v55, %v2674_v9 }
 0xd81   :  { %2295 = vmatprep.subr.mxu1 %v2555_v0 }
 0xd82   :  { %2296 = vmatpush3.msra.mxu1 %v2630_v5 }
 0xd83   :  { %2297 = vmatprep.subr.mxu1 %v2555_v0 }
 0xd84   :  { %2298 = vmatpush3.msra.mxu1 %v2638_v6 }
 0xd85   :  { %2299 = vmatprep.subr.mxu1 %v2555_v0 }
 0xd86   :  { %2300 = vmatpush3.msra.mxu1 %v2646_v7  ;;  %v1010_v21 = vld [vmem:[#allocation2 + $0x20] sm:$0xff] }
 0xd87   :  { %2324 = vmatprep.subr.mxu1 %v2555_v0 }
 0xe3f   :  { %v768_v56 = vpop.f32.mrf.mxu1 }
 0xe40   :  { %v772_v59 = vadd.f32 %v768_v56, %v171_v2 }
 0xe41   :  { %v2281_v60 = vpop.f32.mrf.mxu1 }
 0xe42   :  { %2467 = vtanh.f32 %v772_v59  ;;  %v2065_v5 = vmul.f32 -1.442695, %v772_v59 }
 0xe44   :  { %2469 = vpow2.f32 %v2065_v5 }
 0xe4f   :  { %v2468_v61 = vpop.eup %2467 }
 0xe50   :  { %782 = vrot.lane.b32.xlu0 %v2468_v61, %s2557_s23 }
 0xe51   :  { %v2470_v62 = vpop.eup %2469 }
 0xe52   :  { %v776_v6 = vadd.f32 1.0, %v2470_v62 }
 0xe54   :  { %2471 = vrcp.f32 %v776_v6 }
 0xe61   :  { %v2472_v63 = vpop.eup %2471 }
 0xe62   :  { %v780_v3 = vmul.f32 %v2472_v63, %v688_v50 }
 0xec2   :  { %v783_v1 = vpop.permute.xlu0 %782 }
 0xec3   :  { %v785_v7 = vmul.f32 %v2472_v63, %v783_v1 }
 0xec5   :  { %787 = vrot.lane.b32.xlu1 %v785_v7, %s2558_s3 }
 0xf37   :  { %v788_v4 = vpop.permute.xlu1 %787 }
 0xf38   :  { %v790_v55 = vadd.f32 %v788_v4, %v780_v3 }
 0xf3a   :  { %2473 = vtanh.f32 %v790_v55 }
 0xf47   :  { %v2474_v10 = vpop.eup %2473 }
 0xf48   :  { %793 = vrot.lane.b32.xlu0 %v2474_v10, %s2557_s23 }
 0xfba   :  { %v794_v11 = vpop.permute.xlu0 %793 }
 0xfbb   :  { %v796_v12 = vmul.f32 %v2472_v63, %v794_v11 }
 0xfbd   :  { %798 = vrot.lane.b32.xlu1 %v796_v12, %s2558_s3 }
0x102f   :  { %v799_v13 = vpop.permute.xlu1 %798 }
0x1030   :  { %801 = vst.msk [vmem:[#allocation2 + $0x28] sm:$0xff] %vm188_vm3, %v799_v13  ;;  %2291 = vmatmul.mubr.msk.f32.vlgmr.msra.gmra.mxu0 %vm188_vm3, %v799_v13 }
0x1031   :  { %2305 = vmatpush3.msra.mxu0 %v1017_v8  ;;  %2312 = vmatprep.mubr.msk.f32.mxu0 %vm188_vm3, %v1006_v15 }
0x1032   :  { %2306 = vmatprep.subr.mxu0 %v1016_v14 }
0x1033   :  { %2307 = vmatpush3.msra.mxu0 %v1016_v14 }
0x1034   :  { %2308 = vmatprep.subr.mxu0 %v1015_v16 }
0x1035   :  { %2309 = vmatpush3.msra.mxu0 %v1015_v16 }
0x1036   :  { %2310 = vmatprep.subr.mxu0 %v1014_v17 }
0x1037   :  { %2311 = vmatpush3.msra.mxu0 %v1014_v17  ;;  %v1011_v22 = vld [vmem:[#allocation2 + $0x28] sm:$0xff] }
0x1038   :  { %2313 = vmatmul.mubr.msk.f32.vlgmr.msra.gmra.mxu0 %vm188_vm3, %v1007_v18  ;;  %2346 = vmatprep.subr.mxu0 %v2555_v0 }
0x1039   :  { %2315 = vmatprep.mubr.msk.f32.mxu0 %vm188_vm3, %v1008_v19  ;;  %2347 = vmatpush3.msra.mxu0 %v2833_v37 }
0x103a   :  { %2348 = vmatprep.subr.mxu0 %v2555_v0 }
0x103b   :  { %2349 = vmatpush3.msra.mxu0 %v2839_v38 }
0x103c   :  { %2316 = vmatmul.mubr.msk.f32.gmra.mxu0 %vm188_vm3, %v1009_v20  ;;  %2350 = vmatprep.subr.mxu0 %v2555_v0 }
0x103d   :  { %2318 = vmatprep.mubr.msk.f32.mxu0 %vm188_vm3, %v1010_v21  ;;  %2351 = vmatpush3.msra.mxu0 %v2846_v39 }
0x103e   :  { %2352 = vmatprep.subr.mxu0 %v2555_v0 }
0x103f   :  { %2353 = vmatpush3.msra.mxu0 %v2853_v40 }
0x1040   :  { %2319 = vmatmul.mubr.msk.f32.gmra.mxu0 %vm188_vm3, %v1011_v22  ;;  %2368 = vmatprep.subr.mxu0 %v2555_v0 }
0x10f0   :  { %v870_v24 = vpop.f32.mrf.mxu0 }
0x10f1   :  { %v874_v25 = vadd.f32 %v870_v24, %v176_v23 }
0x10f2   :  { %v2292_v26 = vpop.f32.mrf.mxu0 }
0x10f3   :  { %2475 = vtanh.f32 %v874_v25  ;;  %v2067_v28 = vmul.f32 -1.442695, %v874_v25 }
0x10f5   :  { %2477 = vpow2.f32 %v2067_v28 }
0x10f8   :  { %v2885_v46 = vpop.f32.mrf.mxu0 }
0x10f9   :  { %v1121_v21 = vadd.f32 %v2885_v46, %v2890_v51 }
0x10fa   :  { %v1115_v50 = vpop.f32.mrf.mxu0 }
0x10fb   :  { %v1116_v52 = vadd.f32 %v2890_v51, %v1115_v50 }
0x1100   :  { %v2476_v27 = vpop.eup %2475 }
0x1101   :  { %884 = vrot.lane.b32.xlu0 %v2476_v27, %s2557_s23 }
0x1102   :  { %v2478_v29 = vpop.eup %2477 }
0x1103   :  { %v878_v30 = vadd.f32 1.0, %v2478_v29 }
0x1105   :  { %2479 = vrcp.f32 %v878_v30 }
0x1112   :  { %v2480_v31 = vpop.eup %2479 }
0x1113   :  { %v882_v34 = vmul.f32 %v2480_v31, %v790_v55 }
0x1173   :  { %v885_v32 = vpop.permute.xlu0 %884 }
0x1174   :  { %v887_v33 = vmul.f32 %v2480_v31, %v885_v32 }
0x1176   :  { %889 = vrot.lane.b32.xlu1 %v887_v33, %s2558_s3 }
0x11e8   :  { %v890_v35 = vpop.permute.xlu1 %889 }
0x11e9   :  { %v2826_v58 = vadd.f32 %v890_v35, %v882_v34 }
0x11eb   :  { %2481 = vtanh.f32 %v2826_v58 }
0x11f8   :  { %v2482_v36 = vpop.eup %2481 }
0x11f9   :  { %895 = vrot.lane.b32.xlu0 %v2482_v36, %s2557_s23 }
0x126b   :  { %v896_v41 = vpop.permute.xlu0 %895 }
0x126c   :  { %v898_v42 = vmul.f32 %v2480_v31, %v896_v41 }
0x126e   :  { %900 = vrot.lane.b32.xlu1 %v898_v42, %s2558_s3 }
0x12e0   :  { %v901_v43 = vpop.permute.xlu1 %900 }
0x12e1   :  { %903 = vst.msk [vmem:[#allocation2 + $0x30] sm:$0xff] %vm188_vm3, %v901_v43  ;;  %2302 = vmatmul.mubr.msk.f32.vlgmr.msra.gmra.mxu1 %vm188_vm3, %v901_v43 }
0x12e2   :  { %2325 = vmatpush3.msra.mxu1 %v2833_v37  ;;  %2332 = vmatprep.mubr.msk.f32.mxu1 %vm2556_vm2, %v2555_v0 }
0x12e3   :  { %2326 = vmatprep.subr.mxu1 %v2555_v0 }
0x12e4   :  { %2327 = vmatpush3.msra.mxu1 %v2839_v38 }
0x12e5   :  { %2328 = vmatprep.subr.mxu1 %v2555_v0 }
0x12e6   :  { %2329 = vmatpush3.msra.mxu1 %v2846_v39 }
0x12e7   :  { %2330 = vmatprep.subr.mxu1 %v2555_v0 }
0x12e8   :  { %2331 = vmatpush3.msra.mxu1 %v2853_v40  ;;  %v1012_v44 = vld [vmem:[#allocation2 + $0x30] sm:$0xff] }
0x12e9   :  { %2333 = vmatmul.mubr.f32.vlgmr.msra.gmra.mxu1 %v2555_v0  ;;  %2321 = vmatprep.mubr.msk.f32.mxu0 %vm188_vm3, %v1012_v44  ;;  %v2317_v44 = vpop.f32.mrf.mxu0 }
0x12ea   :  { %2335 = vmatprep.subr.mxu1 %v2555_v0  ;;  %2343 = vmatprep.mubr.msk.f32.mxu1 %vm2556_vm2, %v2555_v0 }
0x12eb   :  { %2336 = vmatpush3.msra.mxu1 %v2833_v37 }
0x12ec   :  { %2337 = vmatprep.subr.mxu1 %v2555_v0 }
0x12ed   :  { %2338 = vmatpush3.msra.mxu1 %v2839_v38 }
0x12ee   :  { %2339 = vmatprep.subr.mxu1 %v2555_v0 }
0x12ef   :  { %2340 = vmatpush3.msra.mxu1 %v2846_v39 }
0x12f0   :  { %2341 = vmatprep.subr.mxu1 %v2555_v0 }
0x12f1   :  { %2342 = vmatpush3.msra.mxu1 %v2853_v40 }
0x12f2   :  { %2357 = vmatprep.subr.mxu1 %v2555_v0 }
0x13a1   :  { %v972_v47 = vpop.f32.mrf.mxu1 }
0x13a2   :  { %v976_v48 = vadd.f32 %v972_v47, %v181_v45  ;;  %v1125_v45 = vpop.f32.mrf.mxu0 }
0x13a3   :  { %v2303_v49 = vpop.f32.mrf.mxu1  ;;  %v1126_v50 = vadd.f32 %v2890_v51, %v1125_v45 }
0x13a4   :  { %v2069_v3 = vmul.f32 -1.442695, %v976_v48  ;;  %v2934_v46 = vpop.f32.mrf.mxu0 }
0x13a6   :  { %v2936_v47 = vpop.f32.mrf.mxu0 }
0x13a9   :  { %v1224_v53 = vpop.f32.mrf.mxu1 }
0x13aa   :  { %v1228_v54 = vadd.f32 %v1224_v53, %v1116_v52 }
0x13ab   :  { %v2334_v2 = vpop.f32.mrf.mxu1 }
0x13ac   :  { %2483 = vtanh.f32 %v1228_v54  ;;  %v2079_v9 = vmul.f32 -1.442695, %v1228_v54 }
0x13ae   :  { %2485 = vpow2.f32 %v2079_v9 }
0x13b9   :  { %v2484_v56 = vpop.eup %2483 }
0x13ba   :  { %1238 = vrot.lane.b32.xlu0 %v2484_v56, %s2557_s23 }
0x13bb   :  { %v2486_v57 = vpop.eup %2485 }
0x13bc   :  { %v1232_v59 = vadd.f32 1.0, %v2486_v57 }
0x13be   :  { %2487 = vrcp.f32 %v1232_v59 }
0x13cb   :  { %v2488_v60 = vpop.eup %2487 }
0x13cc   :  { %v1236_v62 = vmul.f32 0.0, %v2488_v60 }
0x142c   :  { %v1239_v61 = vpop.permute.xlu0 %1238 }
0x142d   :  { %v1241_v5 = vmul.f32 %v2488_v60, %v1239_v61 }
0x142f   :  { %1243 = vrot.lane.b32.xlu1 %v1241_v5, %s2558_s3 }
0x14a1   :  { %v1244_v6 = vpop.permute.xlu1 %1243 }
0x14a2   :  { %v1246_v63 = vadd.f32 %v1244_v6, %v1236_v62 }
0x14a4   :  { %2489 = vtanh.f32 %v1246_v63 }
0x14a5   :  { %2491 = vtanh.f32 %v976_v48 }
0x14a6   :  { %2493 = vpow2.f32 %v2069_v3 }
0x14b1   :  { %v2490_v1 = vpop.eup %2489 }
0x14b2   :  { %1249 = vrot.lane.b32.xlu0 %v2490_v1, %s2557_s23  ;;  %v2492_v7 = vpop.eup %2491 }
0x14b3   :  { %v2494_v4 = vpop.eup %2493 }
0x14b4   :  { %v980_v55 = vadd.f32 1.0, %v2494_v4  ;;  %v1131_v4 = vadd.f32 %v2317_v44, %v2890_v51 }
0x14b6   :  { %986 = vrot.lane.b32.xlu0 %v2492_v7, %s2557_s23  ;;  %2495 = vrcp.f32 %v980_v55 }
0x14c3   :  { %v2496_v11 = vpop.eup %2495 }
0x14c4   :  { %v984_v15 = vmul.f32 %v2496_v11, %v2826_v58 }
0x1524   :  { %v1250_v8 = vpop.permute.xlu0 %1249 }
0x1525   :  { %v1252_v10 = vmul.f32 %v2488_v60, %v1250_v8 }
0x1527   :  { %1254 = vrot.lane.b32.xlu1 %v1252_v10, %s2558_s3 }
0x1528   :  { %v987_v12 = vpop.permute.xlu0 %986 }
0x1529   :  { %v989_v13 = vmul.f32 %v2496_v11, %v987_v12 }
0x152b   :  { %991 = vrot.lane.b32.xlu0 %v989_v13, %s2558_s3 }
0x1599   :  { %v1255_v14 = vpop.permute.xlu1 %1254 }
0x159a   :  { %2344 = vmatmul.mubr.msk.f32.vlgmr.msra.gmra.mxu1 %vm188_vm3, %v1255_v14 }
0x159b   :  { %2358 = vmatpush3.msra.mxu1 %v2833_v37  ;;  %2365 = vmatprep.mubr.msk.f32.mxu1 %vm2556_vm2, %v2555_v0 }
0x159c   :  { %2359 = vmatprep.subr.mxu1 %v2555_v0 }
0x159d   :  { %v992_v16 = vpop.permute.xlu0 %991  ;;  %2360 = vmatpush3.msra.mxu1 %v2839_v38 }
0x159e   :  { %v994_v17 = vadd.f32 %v992_v16, %v984_v15  ;;  %2361 = vmatprep.subr.mxu1 %v2555_v0 }
0x159f   :  { %2362 = vmatpush3.msra.mxu1 %v2846_v39 }
0x15a0   :  { %2497 = vtanh.f32 %v994_v17  ;;  %2363 = vmatprep.subr.mxu1 %v2555_v0 }
0x15a1   :  { %2364 = vmatpush3.msra.mxu1 %v2853_v40 }
0x15a2   :  { %2379 = vmatprep.subr.mxu1 %v2555_v0 }
0x15ad   :  { %v2498_v18 = vpop.eup %2497 }
0x15ae   :  { %997 = vrot.lane.b32.xlu0 %v2498_v18, %s2557_s23 }
0x1620   :  { %v998_v19 = vpop.permute.xlu0 %997 }
0x1621   :  { %v1000_v20 = vmul.f32 %v2496_v11, %v998_v19 }
0x1623   :  { %1002 = vrot.lane.b32.xlu0 %v1000_v20, %s2558_s3 }
0x165a   :  { %v1324_v22 = vpop.f32.mrf.mxu1 }
0x165b   :  { %v1328_v23 = vadd.f32 %v1324_v22, %v1121_v21 }
0x165c   :  { %v2345_v24 = vpop.f32.mrf.mxu1 }
0x165d   :  { %2499 = vtanh.f32 %v1328_v23  ;;  %v2081_v28 = vmul.f32 -1.442695, %v1328_v23 }
0x165f   :  { %2501 = vpow2.f32 %v2081_v28 }
0x166a   :  { %v2500_v25 = vpop.eup %2499 }
0x166b   :  { %1338 = vrot.lane.b32.xlu1 %v2500_v25, %s2557_s23  ;;  %v1136_v25 = vadd.f32 %v2890_v51, %v2936_v47  ;;  %v1141_v47 = vadd.f32 %v2934_v46, %v2890_v51 }
0x166c   :  { %v2502_v29 = vpop.eup %2501 }
0x166d   :  { %v1332_v30 = vadd.f32 1.0, %v2502_v29 }
0x166f   :  { %2503 = vrcp.f32 %v1332_v30 }
0x167c   :  { %v2504_v31 = vpop.eup %2503 }
0x167d   :  { %v1336_v34 = vmul.f32 %v2504_v31, %v1246_v63 }
0x1695   :  { %v1003_v26 = vpop.permute.xlu0 %1002 }
0x1696   :  { %1005 = vst.msk [vmem:[#allocation2 + $0x38] sm:$0xff] %vm188_vm3, %v1003_v26 }
0x169d   :  { %v1013_v27 = vld [vmem:[#allocation2 + $0x38] sm:$0xff] }
0x169e   :  { %2322 = vmatmul.mubr.msk.f32.gmra.mxu0 %vm188_vm3, %v1013_v27 }
0x169f   :  { %2354 = vmatprep.mubr.msk.f32.mxu0 %vm2556_vm2, %v2555_v0 }
0x16dd   :  { %v1339_v32 = vpop.permute.xlu1 %1338 }
0x16de   :  { %v1341_v33 = vmul.f32 %v2504_v31, %v1339_v32 }
0x16e0   :  { %1343 = vrot.lane.b32.xlu1 %v1341_v33, %s2558_s3 }
0x1752   :  { %v1344_v35 = vpop.permute.xlu1 %1343 }
0x1753   :  { %v1346_v58 = vadd.f32 %v1344_v35, %v1336_v34 }
0x1755   :  { %2505 = vtanh.f32 %v1346_v58 }
0x175e   :  { %v2938_v48 = vpop.f32.mrf.mxu0 }
0x1760   :  { %v2940_v49 = vpop.f32.mrf.mxu0 }
0x1762   :  { %v2506_v36 = vpop.eup %2505 }
0x1763   :  { %1349 = vrot.lane.b32.xlu1 %v2506_v36, %s2557_s23 }
0x17d5   :  { %v1350_v41 = vpop.permute.xlu1 %1349 }
0x17d6   :  { %v1352_v42 = vmul.f32 %v2504_v31, %v1350_v41 }
0x17d8   :  { %1354 = vrot.lane.b32.xlu1 %v1352_v42, %s2558_s3 }
0x184a   :  { %v1355_v43 = vpop.permute.xlu1 %1354 }
0x184b   :  { %2355 = vmatmul.mubr.msk.f32.vlgmr.msra.gmra.mxu0 %vm188_vm3, %v1355_v43 }
0x184c   :  { %2369 = vmatpush3.msra.mxu0 %v2833_v37  ;;  %2376 = vmatprep.mubr.msk.f32.mxu0 %vm2556_vm2, %v2555_v0 }
0x184d   :  { %2370 = vmatprep.subr.mxu0 %v2555_v0 }
0x184e   :  { %2371 = vmatpush3.msra.mxu0 %v2839_v38 }
0x184f   :  { %2372 = vmatprep.subr.mxu0 %v2555_v0 }
0x1850   :  { %2373 = vmatpush3.msra.mxu0 %v2846_v39 }
0x1851   :  { %2374 = vmatprep.subr.mxu0 %v2555_v0 }
0x1852   :  { %2375 = vmatpush3.msra.mxu0 %v2853_v40 }
0x1853   :  { %2390 = vmatprep.subr.mxu0 %v2555_v0 }
0x190b   :  { %v1424_v52 = vpop.f32.mrf.mxu0 }
0x190c   :  { %v1428_v53 = vadd.f32 %v1424_v52, %v1126_v50 }
0x190d   :  { %v2356_v54 = vpop.f32.mrf.mxu0 }
0x190e   :  { %2507 = vtanh.f32 %v1428_v53  ;;  %v2083_v56 = vmul.f32 -1.442695, %v1428_v53 }
0x1910   :  { %2509 = vpow2.f32 %v2083_v56 }
0x191b   :  { %v2508_v2 = vpop.eup %2507 }
0x191c   :  { %1438 = vrot.lane.b32.xlu0 %v2508_v2, %s2557_s23 }
0x191d   :  { %v2510_v9 = vpop.eup %2509 }
0x191e   :  { %v1432_v57 = vadd.f32 1.0, %v2510_v9 }
0x1920   :  { %2511 = vrcp.f32 %v1432_v57 }
0x192d   :  { %v2512_v59 = vpop.eup %2511 }
0x192e   :  { %v1436_v5 = vmul.f32 %v2512_v59, %v1346_v58 }
0x198e   :  { %v1439_v60 = vpop.permute.xlu0 %1438 }
0x198f   :  { %v1441_v61 = vmul.f32 %v2512_v59, %v1439_v60 }
0x1991   :  { %1443 = vrot.lane.b32.xlu1 %v1441_v61, %s2558_s3 }
0x1a03   :  { %v1444_v62 = vpop.permute.xlu1 %1443 }
0x1a04   :  { %v1446_v6 = vadd.f32 %v1444_v62, %v1436_v5  ;;  %v1146_v62 = vadd.f32 %v2890_v51, %v2940_v49 }
0x1a06   :  { %2513 = vtanh.f32 %v1446_v6 }
0x1a13   :  { %v2514_v63 = vpop.eup %2513 }
0x1a14   :  { %1449 = vrot.lane.b32.xlu0 %v2514_v63, %s2557_s23 }
0x1a86   :  { %v1450_v1 = vpop.permute.xlu0 %1449 }
0x1a87   :  { %v1452_v7 = vmul.f32 %v2512_v59, %v1450_v1 }
0x1a89   :  { %1454 = vrot.lane.b32.xlu1 %v1452_v7, %s2558_s3 }
0x1afb   :  { %v1455_v3 = vpop.permute.xlu1 %1454 }
0x1afc   :  { %2366 = vmatmul.mubr.msk.f32.vlgmr.msra.gmra.mxu1 %vm188_vm3, %v1455_v3 }
0x1afd   :  { %2380 = vmatpush3.msra.mxu1 %v2833_v37  ;;  %2387 = vmatprep.mubr.msk.f32.mxu1 %vm2556_vm2, %v2555_v0 }
0x1afe   :  { %2381 = vmatprep.subr.mxu1 %v2555_v0 }
0x1aff   :  { %2382 = vmatpush3.msra.mxu1 %v2839_v38 }
0x1b00   :  { %2383 = vmatprep.subr.mxu1 %v2555_v0 }
0x1b01   :  { %2384 = vmatpush3.msra.mxu1 %v2846_v39 }
0x1b02   :  { %2385 = vmatprep.subr.mxu1 %v2555_v0 }
0x1b03   :  { %2386 = vmatpush3.msra.mxu1 %v2853_v40 }
0x1b04   :  { %2401 = vmatprep.subr.mxu1 %v2555_v0 }
0x1bbc   :  { %v1524_v55 = vpop.f32.mrf.mxu1 }
0x1bbd   :  { %v1528_v8 = vadd.f32 %v1524_v55, %v1131_v4 }
0x1bbe   :  { %v2367_v10 = vpop.f32.mrf.mxu1 }
0x1bbf   :  { %2515 = vtanh.f32 %v1528_v8  ;;  %v2085_v12 = vmul.f32 -1.442695, %v1528_v8 }
0x1bc1   :  { %2517 = vpow2.f32 %v2085_v12 }
0x1bcc   :  { %v2516_v11 = vpop.eup %2515 }
0x1bcd   :  { %1538 = vrot.lane.b32.xlu0 %v2516_v11, %s2557_s23 }
0x1bce   :  { %v2518_v13 = vpop.eup %2517 }
0x1bcf   :  { %v1532_v14 = vadd.f32 1.0, %v2518_v13 }
0x1bd1   :  { %2519 = vrcp.f32 %v1532_v14 }
0x1bde   :  { %v2520_v15 = vpop.eup %2519 }
0x1bdf   :  { %v1536_v18 = vmul.f32 %v2520_v15, %v1446_v6 }
0x1c3f   :  { %v1539_v16 = vpop.permute.xlu0 %1538 }
0x1c40   :  { %v1541_v17 = vmul.f32 %v2520_v15, %v1539_v16 }
0x1c42   :  { %1543 = vrot.lane.b32.xlu1 %v1541_v17, %s2558_s3 }
0x1cb4   :  { %v1544_v19 = vpop.permute.xlu1 %1543 }
0x1cb5   :  { %v1546_v20 = vadd.f32 %v1544_v19, %v1536_v18  ;;  %v1151_v18 = vadd.f32 %v2938_v48, %v2890_v51  ;;  %v1956_v48 = vld [vmem:[%s3041_s7 + $0x18] sm:$0xff] }
0x1cb7   :  { %2521 = vtanh.f32 %v1546_v20 }
0x1cc4   :  { %v2522_v21 = vpop.eup %2521 }
0x1cc5   :  { %1549 = vrot.lane.b32.xlu0 %v2522_v21, %s2557_s23 }
0x1d37   :  { %v1550_v22 = vpop.permute.xlu0 %1549 }
0x1d38   :  { %v1552_v23 = vmul.f32 %v2520_v15, %v1550_v22 }
0x1d3a   :  { %1554 = vrot.lane.b32.xlu1 %v1552_v23, %s2558_s3 }
0x1dac   :  { %v1555_v24 = vpop.permute.xlu1 %1554 }
0x1dad   :  { %2377 = vmatmul.mubr.msk.f32.vlgmr.msra.gmra.mxu0 %vm188_vm3, %v1555_v24 }
0x1dae   :  { %2391 = vmatpush3.msra.mxu0 %v2833_v37  ;;  %2398 = vmatprep.mubr.msk.f32.mxu0 %vm2556_vm2, %v2555_v0 }
0x1daf   :  { %2392 = vmatprep.subr.mxu0 %v2555_v0 }
0x1db0   :  { %2393 = vmatpush3.msra.mxu0 %v2839_v38 }
0x1db1   :  { %2394 = vmatprep.subr.mxu0 %v2555_v0 }
0x1db2   :  { %2395 = vmatpush3.msra.mxu0 %v2846_v39 }
0x1db3   :  { %2396 = vmatprep.subr.mxu0 %v2555_v0 }
0x1db4   :  { %2397 = vmatpush3.msra.mxu0 %v2853_v40 }
0x1db5   :  { %2412 = vmatprep.subr.mxu0 %v2555_v0 }
0x1e6d   :  { %v1624_v26 = vpop.f32.mrf.mxu0 }
0x1e6e   :  { %v1628_v27 = vadd.f32 %v1624_v26, %v1136_v25 }
0x1e6f   :  { %v2378_v28 = vpop.f32.mrf.mxu0 }
0x1e70   :  { %2523 = vtanh.f32 %v1628_v27  ;;  %v2087_v30 = vmul.f32 -1.442695, %v1628_v27 }
0x1e72   :  { %2525 = vpow2.f32 %v2087_v30 }
0x1e7d   :  { %v2524_v29 = vpop.eup %2523 }
0x1e7e   :  { %1638 = vrot.lane.b32.xlu0 %v2524_v29, %s2557_s23 }
0x1e7f   :  { %v2526_v31 = vpop.eup %2525 }
0x1e80   :  { %v1632_v32 = vadd.f32 1.0, %v2526_v31  ;;  %v1955_v31 = vld [vmem:[%s3041_s7 + $0x10] sm:$0xff] }
0x1e82   :  { %2527 = vrcp.f32 %v1632_v32  ;;  %v1954_v32 = vld [vmem:[%s3041_s7 + $0x8] sm:$0xff] }
0x1e8f   :  { %v2528_v33 = vpop.eup %2527 }
0x1e90   :  { %v1636_v58 = vmul.f32 %v2528_v33, %v1546_v20 }
0x1ef0   :  { %v1639_v34 = vpop.permute.xlu0 %1638 }
0x1ef1   :  { %v1641_v35 = vmul.f32 %v2528_v33, %v1639_v34 }
0x1ef3   :  { %1643 = vrot.lane.b32.xlu1 %v1641_v35, %s2558_s3  ;;  %v14_v35 = vstv %s3042_s8 }
0x1ef4   :  { %15 = vst [vmem:[#allocation3] sm:$0x1] %v14_v35 }
0x1f65   :  { %v1644_v36 = vpop.permute.xlu1 %1643 }
0x1f66   :  { %v1646_v41 = vadd.f32 %v1644_v36, %v1636_v58 }
0x1f68   :  { %2529 = vtanh.f32 %v1646_v41 }
0x1f75   :  { %v2530_v42 = vpop.eup %2529 }
0x1f76   :  { %1649 = vrot.lane.b32.xlu0 %v2530_v42, %s2557_s23  ;;  %v2094_v42 = vld [vmem:[#allocation3] ss:$0 sm:$0xff] }
0x1fe8   :  { %v1650_v43 = vpop.permute.xlu0 %1649 }
0x1fe9   :  { %v1652_v44 = vmul.f32 %v2528_v33, %v1650_v43  ;;  %v1953_v33 = vld [vmem:[%s3041_s7] sm:$0xff] }
0x1feb   :  { %1654 = vrot.lane.b32.xlu1 %v1652_v44, %s2558_s3 }
0x205d   :  { %v1655_v45 = vpop.permute.xlu1 %1654 }
0x205e   :  { %2388 = vmatmul.mubr.msk.f32.vlgmr.msra.gmra.mxu1 %vm188_vm3, %v1655_v45 }
0x205f   :  { %2402 = vmatpush3.msra.mxu1 %v2833_v37  ;;  %2409 = vmatprep.mubr.msk.f32.mxu1 %vm2556_vm2, %v2555_v0 }
0x2060   :  { %2403 = vmatprep.subr.mxu1 %v2555_v0 }
0x2061   :  { %2404 = vmatpush3.msra.mxu1 %v2839_v38 }
0x2062   :  { %2405 = vmatprep.subr.mxu1 %v2555_v0 }
0x2063   :  { %2406 = vmatpush3.msra.mxu1 %v2846_v39 }
0x2064   :  { %2407 = vmatprep.subr.mxu1 %v2555_v0 }
0x2065   :  { %2408 = vmatpush3.msra.mxu1 %v2853_v40 }
0x211e   :  { %v1724_v50 = vpop.f32.mrf.mxu1 }
0x211f   :  { %v1728_v37 = vadd.f32 %v1724_v50, %v1141_v47 }
0x2120   :  { %v2389_v52 = vpop.f32.mrf.mxu1 }
0x2121   :  { %2531 = vtanh.f32 %v1728_v37  ;;  %v2089_v54 = vmul.f32 -1.442695, %v1728_v37 }
0x2123   :  { %2533 = vpow2.f32 %v2089_v54 }
0x212e   :  { %v2532_v53 = vpop.eup %2531 }
0x212f   :  { %1738 = vrot.lane.b32.xlu0 %v2532_v53, %s2557_s23 }
0x2130   :  { %v2534_v38 = vpop.eup %2533 }
0x2131   :  { %v1732_v2 = vadd.f32 1.0, %v2534_v38 }
0x2133   :  { %2535 = vrcp.f32 %v1732_v2 }
0x2140   :  { %v2536_v39 = vpop.eup %2535 }
0x2141   :  { %v1736_v40 = vmul.f32 %v2536_v39, %v1646_v41 }
0x21a1   :  { %v1739_v56 = vpop.permute.xlu0 %1738 }
0x21a2   :  { %v1741_v9 = vmul.f32 %v2536_v39, %v1739_v56 }
0x21a4   :  { %1743 = vrot.lane.b32.xlu1 %v1741_v9, %s2558_s3 }
0x2216   :  { %v1744_v57 = vpop.permute.xlu1 %1743 }
0x2217   :  { %v1746_v46 = vadd.f32 %v1744_v57, %v1736_v40 }
0x2219   :  { %2537 = vtanh.f32 %v1746_v46 }
0x2226   :  { %v2538_v59 = vpop.eup %2537 }
0x2227   :  { %1749 = vrot.lane.b32.xlu0 %v2538_v59, %s2557_s23 }
0x2299   :  { %v1750_v60 = vpop.permute.xlu0 %1749 }
0x229a   :  { %v1752_v61 = vmul.f32 %v2536_v39, %v1750_v60 }
0x229c   :  { %1754 = vrot.lane.b32.xlu1 %v1752_v61, %s2558_s3 }
0x230e   :  { %v1755_v5 = vpop.permute.xlu1 %1754 }
0x230f   :  { %2399 = vmatmul.mubr.msk.f32.vlgmr.msra.gmra.mxu0 %vm188_vm3, %v1755_v5 }
0x2310   :  { %2420 = vmatprep.mubr.msk.f32.mxu0 %vm2556_vm2, %v2555_v0  ;;  %2413 = vmatpush3.msra.mxu0 %v1956_v48 }
0x2311   :  { %2414 = vmatprep.subr.mxu0 %v2555_v0 }
0x2312   :  { %2415 = vmatpush3.msra.mxu0 %v1955_v31 }
0x2313   :  { %2416 = vmatprep.subr.mxu0 %v2555_v0 }
0x2314   :  { %2417 = vmatpush3.msra.mxu0 %v1954_v32 }
0x2315   :  { %2418 = vmatprep.subr.mxu0 %v2555_v0 }
0x2316   :  { %2419 = vmatpush3.msra.mxu0 %v1953_v33 }
0x23cf   :  { %v1824_v6 = vpop.f32.mrf.mxu0 }
0x23d0   :  { %v1828_v63 = vadd.f32 %v1824_v6, %v1146_v62 }
0x23d1   :  { %v2400_v1 = vpop.f32.mrf.mxu0 }
0x23d2   :  { %2539 = vtanh.f32 %v1828_v63  ;;  %v2091_v3 = vmul.f32 -1.442695, %v1828_v63 }
0x23d4   :  { %2541 = vpow2.f32 %v2091_v3 }
0x23df   :  { %v2540_v7 = vpop.eup %2539 }
0x23e0   :  { %1838 = vrot.lane.b32.xlu0 %v2540_v7, %s2557_s23 }
0x23e1   :  { %v2542_v4 = vpop.eup %2541 }
0x23e2   :  { %v1832_v55 = vadd.f32 1.0, %v2542_v4 }
0x23e4   :  { %2543 = vrcp.f32 %v1832_v55 }
0x23f1   :  { %v2544_v8 = vpop.eup %2543 }
0x23f2   :  { %v1836_v12 = vmul.f32 %v2544_v8, %v1746_v46 }
0x2452   :  { %v1839_v10 = vpop.permute.xlu0 %1838 }
0x2453   :  { %v1841_v11 = vmul.f32 %v2544_v8, %v1839_v10 }
0x2455   :  { %1843 = vrot.lane.b32.xlu1 %v1841_v11, %s2558_s3 }
0x24c7   :  { %v1844_v13 = vpop.permute.xlu1 %1843 }
0x24c8   :  { %v1846_v49 = vadd.f32 %v1844_v13, %v1836_v12 }
0x24ca   :  { %2545 = vtanh.f32 %v1846_v49 }
0x24d7   :  { %v2546_v14 = vpop.eup %2545 }
0x24d8   :  { %1849 = vrot.lane.b32.xlu0 %v2546_v14, %s2557_s23 }
0x254a   :  { %v1850_v15 = vpop.permute.xlu0 %1849 }
0x254b   :  { %v1852_v16 = vmul.f32 %v2544_v8, %v1850_v15 }
0x254d   :  { %1854 = vrot.lane.b32.xlu1 %v1852_v16, %s2558_s3 }
0x25bf   :  { %v1855_v17 = vpop.permute.xlu1 %1854 }
0x25c0   :  { %2410 = vmatmul.mubr.msk.f32.vlgmr.msra.gmra.mxu1 %vm188_vm3, %v1855_v17 }
0x2680   :  { %v1924_v19 = vpop.f32.mrf.mxu1 }
0x2681   :  { %v1928_v20 = vadd.f32 %v1924_v19, %v1151_v18 }
0x2682   :  { %v2411_v21 = vpop.f32.mrf.mxu1 }
0x2683   :  { %2547 = vtanh.f32 %v1928_v20  ;;  %v2093_v23 = vmul.f32 -1.442695, %v1928_v20 }
0x2685   :  { %2549 = vpow2.f32 %v2093_v23 }
0x2690   :  { %v2548_v22 = vpop.eup %2547 }
0x2691   :  { %1938 = vrot.lane.b32.xlu0 %v2548_v22, %s2557_s23 }
0x2692   :  { %v2550_v24 = vpop.eup %2549 }
0x2693   :  { %v1932_v25 = vadd.f32 1.0, %v2550_v24 }
0x2695   :  { %2551 = vrcp.f32 %v1932_v25 }
0x26a2   :  { %v2552_v26 = vpop.eup %2551 }
0x26a3   :  { %v1936_v29 = vmul.f32 %v2552_v26, %v1846_v49 }
0x2703   :  { %v1939_v27 = vpop.permute.xlu0 %1938 }
0x2704   :  { %v1941_v28 = vmul.f32 %v2552_v26, %v1939_v27 }
0x2706   :  { %1943 = vrot.lane.b32.xlu1 %v1941_v28, %s2558_s3 }
0x2778   :  { %v1944_v30 = vpop.permute.xlu1 %1943 }
0x2779   :  { %v1946_v51 = vadd.f32 %v1944_v30, %v1936_v29 }
0x277b   :  { %2553 = vtanh.f32 %v1946_v51 }
0x2788   :  { %v2554_v34 = vpop.eup %2553 }
0x2789   :  { %1949 = vrot.lane.b32.xlu0 %v2554_v34, %s2557_s23 }
0x27fb   :  { %v1950_v58 = vpop.permute.xlu0 %1949 }
0x27fc   :  { %v1952_v36 = vmul.f32 %v2552_v26, %v1950_v58 }
0x27fe   :  { %1965 = vrot.lane.b32.xlu1 %v1952_v36, %s2558_s3 }
0x2870   :  { %v1966_v41 = vpop.permute.xlu1 %1965 }
0x2871   :  { %2421 = vmatmul.mubr.msk.f32.vlgmr.msra.gmra.mxu0 %vm188_vm3, %v1966_v41 }
0x2931   :  { %v2035_v43 = vpop.f32.mrf.mxu0 }
0x2932   :  { %v2036_v0 = vadd.f32 %v2094_v42, %v2035_v43 }
0x2933   :  { %v2422_v44 = vpop.f32.mrf.mxu0 }
0x2934   :  { %2040 = vst.msk [vmem:[%s3043_s9] sm:$0xff] %vm2039_vm4, %v2036_v0 }

</bundles_post_ra>
